<compile_context>
chip_gen: v6e
topology: v6e:2x2x1
jax: 0.10.0
libtpu: 0.0.40
codegen_flags: <defaults>
</compile_context>

<pallas_src>
import functools

import jax
import jax.numpy as jnp
from jax.experimental import pallas as pl
from jax.experimental.pallas import tpu as pltpu


def _gin_kernel(eps_ref, x_ref, abd_ref, pool_ref,
                w1_ref, b1_ref, w2_ref, b2_ref, w3_ref, b3_ref,
                w4_ref, b4_ref, out_ref):
    """One grid step processes GB graphs as flat (GB*N, K) slabs.

    eps_ref : (3,)              f32  SMEM  GIN eps scalars
    x_ref   : (GB*N, F)         f32  VMEM  flat node features
    abd_ref : (1, GB*N, GB*N)   bf16 VMEM  block-diagonal 0/1 adjacency
    pool_ref: (GB, GB*N)        bf16 VMEM  0/1 graph-pooling matrix (resident)
    w*_ref  : bf16 weights (resident); b*_ref: (1, H / 128) f32
    out_ref : (GB, 128)         f32  lane-dense output slab
    """
    a_bd = abd_ref[0]                                    # (GB*N, GB*N) bf16

    def gin_layer(h32, h16, eps, w_ref, b_ref):
        # Neighbor aggregation: ONE lane-dense block-diag bf16 MXU matmul.
        agg = jnp.dot(a_bd, h16, preferred_element_type=jnp.float32)
        # GIN self term (1 + eps) * h : f32 VPU axpy (eps kept out of bf16).
        agg = agg + (1.0 + eps) * h32
        # Linear (+ bias) on the flat slab, bf16 operands / f32 accumulate.
        z = jnp.dot(agg.astype(jnp.bfloat16), w_ref[...],
                    preferred_element_type=jnp.float32) + b_ref[...]
        h32n = jnp.tanh(z)                               # f32 epilogue (v5e-safe)
        return h32n, h32n.astype(jnp.bfloat16)

    h32 = x_ref[...]
    h16 = h32.astype(jnp.bfloat16)
    h32, h16 = gin_layer(h32, h16, eps_ref[0], w1_ref, b1_ref)
    h32, h16 = gin_layer(h32, h16, eps_ref[1], w2_ref, b2_ref)
    h32, h16 = gin_layer(h32, h16, eps_ref[2], w3_ref, b3_ref)

    # global_add_pool: tiny (GB, GB*N) @ (GB*N, H) bf16 matmul, f32 accumulate.
    pooled = jnp.dot(pool_ref[...], h16, preferred_element_type=jnp.float32)

    # fc1 + tanh, padded to 128 output lanes -> unmasked lane-dense store.
    out = jnp.tanh(jnp.dot(pooled.astype(jnp.bfloat16), w4_ref[...],
                           preferred_element_type=jnp.float32) + b4_ref[...])
    out_ref[...] = out


def prepare_params(params):
    """One-time prep (hoisted out of the per-call path): bf16 weight casts and
    zero-padding of fc1 to 128 output lanes."""
    (w1, b1, w2, b2, w3, b3, w4, b4) = params
    c = w4.shape[1]
    pad_c = (-c) % 128
    w4p = jnp.pad(w4, ((0, 0), (0, pad_c)))
    b4p = jnp.pad(b4, ((0, 0), (0, pad_c)))
    prepped = (w1.astype(jnp.bfloat16), b1,
               w2.astype(jnp.bfloat16), b2,
               w3.astype(jnp.bfloat16), b3,
               w4p.astype(jnp.bfloat16), b4p.astype(jnp.float32))
    return prepped, c


def _default_num_blocks(batch):
    """2 "parallel" grid steps on dual-TensorCore chips (v4/v5p megacore, v7x)
    so both cores get work; 1 step on single-TC chips (v5e/v6e) to avoid the
    extra per-step pipeline overhead on this latency-bound kernel."""
    if batch < 2:
        return 1
    try:
        kind = jax.devices()[0].device_kind.lower()
    except Exception:
        return 1
    dual_tc = any(tag in kind for tag in ("v4", "v5p", "v5 p", "7"))
    return 2 if dual_tc else 1


@functools.partial(jax.jit, static_argnames=("num_classes", "num_blocks"))
def gin_net_forward(x, a, prepped, eps, *, num_classes, num_blocks=None):
    """x: [B, N, F] f32 node features; a: [B, N, N] f32 dense adjacency
    (a[b, i, j] = 1 iff edge j->i).  Returns [B, num_classes]."""
    B, N, F = x.shape
    (w1b, b1, w2b, b2, w3b, b3, w4b, b4p) = prepped
    H = w1b.shape[1]
    CP = w4b.shape[1]                           # 128 (lane-dense padded classes)

    if num_blocks is None:
        num_blocks = _default_num_blocks(B)
    GB = -(-B // num_blocks)                    # graphs per grid step
    if num_blocks > 1:
        GB = ((GB + 7) // 8) * 8                # sublane-aligned output block
    Bp = GB * num_blocks
    pad = Bp - B
    if pad:
        x = jnp.pad(x, ((0, pad), (0, 0), (0, 0)))
        a = jnp.pad(a, ((0, pad), (0, 0), (0, 0)))

    # Flat (Bp*N, F) node features: contiguous rows, no in-kernel reshape.
    x_flat = x.reshape(Bp * N, F)

    # One block-diagonal 0/1 adjacency per grid step, bf16 (0/1 exact; eps is
    # NOT baked in - it is applied in-kernel as an f32 axpy).
    a_blocks = a.reshape(num_blocks, GB, N, N)
    eye_gb = jnp.eye(GB, dtype=a.dtype)
    a_bd = jnp.einsum('bgij,gh->bgihj', a_blocks, eye_gb)
    a_bd = a_bd.reshape(num_blocks, GB * N, GB * N).astype(jnp.bfloat16)

    # 0/1 pooling matrix: global_add_pool over each graph's N nodes.
    pool = jnp.repeat(jnp.eye(GB, dtype=jnp.bfloat16), N, axis=1)  # (GB, GB*N)

    eps = jnp.asarray(eps, jnp.float32).reshape(3)

    resident = lambda *shape: pl.BlockSpec(shape, lambda g: (0,) * len(shape))

    out = pl.pallas_call(
        _gin_kernel,
        out_shape=jax.ShapeDtypeStruct((Bp, CP), jnp.float32),
        grid_spec=pltpu.PrefetchScalarGridSpec(
            num_scalar_prefetch=0,
            grid=(num_blocks,),
            in_specs=[
                pl.BlockSpec(memory_space=pltpu.MemorySpace.SMEM),      # eps
                pl.BlockSpec((GB * N, F), lambda g: (g, 0)),            # x flat
                pl.BlockSpec((1, GB * N, GB * N), lambda g: (g, 0, 0)), # A blkdiag
                resident(GB, GB * N),                                   # pool
                resident(F, H), resident(1, H),                         # conv1
                resident(H, H), resident(1, H),                         # conv2
                resident(H, H), resident(1, H),                         # conv3
                resident(H, CP), resident(1, CP),                       # fc1
            ],
            out_specs=pl.BlockSpec((GB, CP), lambda g: (g, 0)),
        ),
        compiler_params=pltpu.CompilerParams(
            dimension_semantics=("parallel",)),
    )(eps, x_flat, a_bd, pool, w1b, b1, w2b, b2, w3b, b3, w4b, b4p)

    return out[:B, :num_classes]


def _ref_forward(x, a, params, eps, *, bf16_matmul=True):
    """Pure-JAX reference. bf16_matmul=True mirrors the kernel's MXU dtypes."""
    (w1, b1, w2, b2, w3, b3, w4, b4) = params
    e1, e2, e3 = eps

    def mm(lhs, rhs):
        if bf16_matmul:
            lhs = lhs.astype(jnp.bfloat16)
            rhs = rhs.astype(jnp.bfloat16)
        return jnp.dot(lhs, rhs, preferred_element_type=jnp.float32)

    def agg_mm(adj, h):
        if bf16_matmul:
            adj = adj.astype(jnp.bfloat16)
            h = h.astype(jnp.bfloat16)
        return jnp.einsum('bij,bjf->bif', adj, h,
                          preferred_element_type=jnp.float32)

    def gin(h, e, w, b):
        agg = agg_mm(a, h) + (1.0 + e) * h
        return jnp.tanh(mm(agg, w) + b)

    h = gin(x, e1, w1, b1)
    h = gin(h, e2, w2, b2)
    h = gin(h, e3, w3, b3)
    if bf16_matmul:
        h = h.astype(jnp.bfloat16).astype(jnp.float32)   # mirror bf16 pooling
    pooled = jnp.sum(h, axis=1)                          # global_add_pool
    return jnp.tanh(mm(pooled, w4) + b4)


def _linear_init(key, fan_in, fan_out):
    # PyTorch nn.Linear default: U(-1/sqrt(fan_in), 1/sqrt(fan_in))
    kw, kb = jax.random.split(key)
    bound = 1.0 / jnp.sqrt(fan_in)
    w = jax.random.uniform(kw, (fan_in, fan_out), jnp.float32, -bound, bound)
    b = jax.random.uniform(kb, (1, fan_out), jnp.float32, -bound, bound)
    return w, b


if __name__ == "__main__":
    key = jax.random.PRNGKey(0)
    # 32 graphs x 8 nodes (nmax=8) x 16 features; hidden 64; 10 classes.
    B, N, F, H, C = 32, 8, 16, 64, 10

    keys = jax.random.split(key, 8)

    # Deterministic synthetic parameters (not a checkpoint).
    w1, b1 = _linear_init(keys[0], F, H)
    w2, b2 = _linear_init(keys[1], H, H)
    w3, b3 = _linear_init(keys[2], H, H)
    w4, b4 = _linear_init(keys[3], H, C)
    params = (w1, b1, w2, b2, w3, b3, w4, b4)

    # train_eps scalars (stand-in for np.random.uniform() in __init__).
    eps = jax.random.uniform(keys[4], (3,), jnp.float32)

    # Node features and symmetric 0/1 adjacency without self loops.
    x = jax.random.normal(keys[5], (B, N, F), jnp.float32)
    adj_logits = jax.random.uniform(keys[6], (B, N, N))
    adj = (adj_logits > 0.5).astype(jnp.float32)
    adj = jnp.maximum(adj, jnp.swapaxes(adj, 1, 2))
    adj = adj * (1.0 - jnp.eye(N, dtype=jnp.float32)[None])

    prepped, _ = prepare_params(params)            # one-time (hoisted) prep
    out = gin_net_forward(x, adj, prepped, eps, num_classes=C)
    jax.block_until_ready(out)

    eps_t = tuple(float(e) for e in eps)
    ref_bf16 = _ref_forward(x, adj, params, eps_t, bf16_matmul=True)
    ref_f32 = _ref_forward(x, adj, params, eps_t, bf16_matmul=False)

    assert out.shape == (B, C)
    assert jnp.allclose(out, ref_bf16, atol=1e-3, rtol=1e-3), \
        float(jnp.max(jnp.abs(out - ref_bf16)))
    assert jnp.allclose(out, ref_f32, atol=5e-2, rtol=5e-2), \
        float(jnp.max(jnp.abs(out - ref_f32)))

    print("KERNEL_OK")
</pallas_src>

<mosaic_0001>
module attributes {stable_mosaic.version = 11 : i64} {
  func.func @_gin_kernel(%arg0: i32, %arg1: memref<3xf32, #tpu.memory_space<smem>>, %arg2: memref<256x16xf32, #tpu.memory_space<vmem>>, %arg3: memref<1x256x256xbf16, #tpu.memory_space<vmem>>, %arg4: memref<32x256xbf16, #tpu.memory_space<vmem>>, %arg5: memref<16x64xbf16, #tpu.memory_space<vmem>>, %arg6: memref<1x64xf32, #tpu.memory_space<vmem>>, %arg7: memref<64x64xbf16, #tpu.memory_space<vmem>>, %arg8: memref<1x64xf32, #tpu.memory_space<vmem>>, %arg9: memref<64x64xbf16, #tpu.memory_space<vmem>>, %arg10: memref<1x64xf32, #tpu.memory_space<vmem>>, %arg11: memref<64x128xbf16, #tpu.memory_space<vmem>>, %arg12: memref<1x128xf32, #tpu.memory_space<vmem>>, %arg13: memref<32x128xf32, #tpu.memory_space<vmem>>) attributes {dimension_semantics = [#tpu.dimension_semantics<parallel>], iteration_bounds = array<i64: 1>, scalar_prefetch = 0 : i64, scratch_operands = 0 : i64, tpu.core_type = #tpu.core_type<tc>, window_params = [{transform_indices = @transform_0, window_bounds = array<i64: 3>}, {transform_indices = @transform_1, window_bounds = array<i64: 256, 16>}, {transform_indices = @transform_2, window_bounds = array<i64: 1, 256, 256>}, {pipeline_mode = #tpu.pipeline_mode<synchronous>, transform_indices = @transform_3, window_bounds = array<i64: 32, 256>}, {pipeline_mode = #tpu.pipeline_mode<synchronous>, transform_indices = @transform_4, window_bounds = array<i64: 16, 64>}, {pipeline_mode = #tpu.pipeline_mode<synchronous>, transform_indices = @transform_5, window_bounds = array<i64: 1, 64>}, {pipeline_mode = #tpu.pipeline_mode<synchronous>, transform_indices = @transform_6, window_bounds = array<i64: 64, 64>}, {pipeline_mode = #tpu.pipeline_mode<synchronous>, transform_indices = @transform_7, window_bounds = array<i64: 1, 64>}, {pipeline_mode = #tpu.pipeline_mode<synchronous>, transform_indices = @transform_8, window_bounds = array<i64: 64, 64>}, {pipeline_mode = #tpu.pipeline_mode<synchronous>, transform_indices = @transform_9, window_bounds = array<i64: 1, 64>}, {pipeline_mode = #tpu.pipeline_mode<synchronous>, transform_indices = @transform_10, window_bounds = array<i64: 64, 128>}, {pipeline_mode = #tpu.pipeline_mode<synchronous>, transform_indices = @transform_11, window_bounds = array<i64: 1, 128>}, {transform_indices = @transform_12, window_bounds = array<i64: 32, 128>}]} {
    %c0 = arith.constant 0 : index
    %c0_0 = arith.constant 0 : index
    %c0_1 = arith.constant 0 : index
    %0 = vector.load %arg3[%c0, %c0_0, %c0_1] : memref<1x256x256xbf16, #tpu.memory_space<vmem>>, vector<1x256x256xbf16>
    %1 = vector.shape_cast %0 : vector<1x256x256xbf16> to vector<256x256xbf16>
    %c0_2 = arith.constant 0 : index
    %c0_3 = arith.constant 0 : index
    %2 = vector.load %arg2[%c0_2, %c0_3] : memref<256x16xf32, #tpu.memory_space<vmem>>, vector<256x16xf32>
    %3 = arith.truncf %2 : vector<256x16xf32> to vector<256x16xbf16>
    %c0_4 = arith.constant 0 : index
    %4 = memref.load %arg1[%c0_4] : memref<3xf32, #tpu.memory_space<smem>>
    %cst = arith.constant dense<0.000000e+00> : vector<256x16xf32>
    %5 = tpu.matmul %1, %3, %cst {dimension_numbers = #tpu.dot_dimension_numbers<[1], [0], [0], [1], [0, 0, 1, 1], [], []>} : vector<256x256xbf16>, vector<256x16xbf16>, vector<256x16xf32> -> vector<256x16xf32>
    %cst_5 = arith.constant 1.000000e+00 : f32
    %6 = arith.addf %cst_5, %4 : f32
    %7 = vector.broadcast %6 : f32 to vector<256x16xf32>
    %8 = arith.mulf %7, %2 : vector<256x16xf32>
    %9 = arith.addf %5, %8 : vector<256x16xf32>
    %10 = arith.truncf %9 : vector<256x16xf32> to vector<256x16xbf16>
    %c0_6 = arith.constant 0 : index
    %c0_7 = arith.constant 0 : index
    %11 = vector.load %arg5[%c0_6, %c0_7] : memref<16x64xbf16, #tpu.memory_space<vmem>>, vector<16x64xbf16>
    %cst_8 = arith.constant dense<0.000000e+00> : vector<256x64xf32>
    %12 = tpu.matmul %10, %11, %cst_8 {dimension_numbers = #tpu.dot_dimension_numbers<[1], [0], [0], [1], [0, 0, 1, 1], [], []>} : vector<256x16xbf16>, vector<16x64xbf16>, vector<256x64xf32> -> vector<256x64xf32>
    %c0_9 = arith.constant 0 : index
    %c0_10 = arith.constant 0 : index
    %13 = vector.load %arg6[%c0_9, %c0_10] : memref<1x64xf32, #tpu.memory_space<vmem>>, vector<1x64xf32>
    %14 = vector.broadcast %13 : vector<1x64xf32> to vector<256x64xf32>
    %15 = arith.addf %12, %14 : vector<256x64xf32>
    %16 = math.tanh %15 : vector<256x64xf32>
    %17 = arith.truncf %16 : vector<256x64xf32> to vector<256x64xbf16>
    %c1 = arith.constant 1 : index
    %18 = memref.load %arg1[%c1] : memref<3xf32, #tpu.memory_space<smem>>
    %cst_11 = arith.constant dense<0.000000e+00> : vector<256x64xf32>
    %19 = tpu.matmul %1, %17, %cst_11 {dimension_numbers = #tpu.dot_dimension_numbers<[1], [0], [0], [1], [0, 0, 1, 1], [], []>} : vector<256x256xbf16>, vector<256x64xbf16>, vector<256x64xf32> -> vector<256x64xf32>
    %cst_12 = arith.constant 1.000000e+00 : f32
    %20 = arith.addf %cst_12, %18 : f32
    %21 = vector.broadcast %20 : f32 to vector<256x64xf32>
    %22 = arith.mulf %21, %16 : vector<256x64xf32>
    %23 = arith.addf %19, %22 : vector<256x64xf32>
    %24 = arith.truncf %23 : vector<256x64xf32> to vector<256x64xbf16>
    %c0_13 = arith.constant 0 : index
    %c0_14 = arith.constant 0 : index
    %25 = vector.load %arg7[%c0_13, %c0_14] : memref<64x64xbf16, #tpu.memory_space<vmem>>, vector<64x64xbf16>
    %cst_15 = arith.constant dense<0.000000e+00> : vector<256x64xf32>
    %26 = tpu.matmul %24, %25, %cst_15 {dimension_numbers = #tpu.dot_dimension_numbers<[1], [0], [0], [1], [0, 0, 1, 1], [], []>} : vector<256x64xbf16>, vector<64x64xbf16>, vector<256x64xf32> -> vector<256x64xf32>
    %c0_16 = arith.constant 0 : index
    %c0_17 = arith.constant 0 : index
    %27 = vector.load %arg8[%c0_16, %c0_17] : memref<1x64xf32, #tpu.memory_space<vmem>>, vector<1x64xf32>
    %28 = vector.broadcast %27 : vector<1x64xf32> to vector<256x64xf32>
    %29 = arith.addf %26, %28 : vector<256x64xf32>
    %30 = math.tanh %29 : vector<256x64xf32>
    %31 = arith.truncf %30 : vector<256x64xf32> to vector<256x64xbf16>
    %c2 = arith.constant 2 : index
    %32 = memref.load %arg1[%c2] : memref<3xf32, #tpu.memory_space<smem>>
    %cst_18 = arith.constant dense<0.000000e+00> : vector<256x64xf32>
    %33 = tpu.matmul %1, %31, %cst_18 {dimension_numbers = #tpu.dot_dimension_numbers<[1], [0], [0], [1], [0, 0, 1, 1], [], []>} : vector<256x256xbf16>, vector<256x64xbf16>, vector<256x64xf32> -> vector<256x64xf32>
    %cst_19 = arith.constant 1.000000e+00 : f32
    %34 = arith.addf %cst_19, %32 : f32
    %35 = vector.broadcast %34 : f32 to vector<256x64xf32>
    %36 = arith.mulf %35, %30 : vector<256x64xf32>
    %37 = arith.addf %33, %36 : vector<256x64xf32>
    %38 = arith.truncf %37 : vector<256x64xf32> to vector<256x64xbf16>
    %c0_20 = arith.constant 0 : index
    %c0_21 = arith.constant 0 : index
    %39 = vector.load %arg9[%c0_20, %c0_21] : memref<64x64xbf16, #tpu.memory_space<vmem>>, vector<64x64xbf16>
    %cst_22 = arith.constant dense<0.000000e+00> : vector<256x64xf32>
    %40 = tpu.matmul %38, %39, %cst_22 {dimension_numbers = #tpu.dot_dimension_numbers<[1], [0], [0], [1], [0, 0, 1, 1], [], []>} : vector<256x64xbf16>, vector<64x64xbf16>, vector<256x64xf32> -> vector<256x64xf32>
    %c0_23 = arith.constant 0 : index
    %c0_24 = arith.constant 0 : index
    %41 = vector.load %arg10[%c0_23, %c0_24] : memref<1x64xf32, #tpu.memory_space<vmem>>, vector<1x64xf32>
    %42 = vector.broadcast %41 : vector<1x64xf32> to vector<256x64xf32>
    %43 = arith.addf %40, %42 : vector<256x64xf32>
    %44 = math.tanh %43 : vector<256x64xf32>
    %45 = arith.truncf %44 : vector<256x64xf32> to vector<256x64xbf16>
    %c0_25 = arith.constant 0 : index
    %c0_26 = arith.constant 0 : index
    %46 = vector.load %arg4[%c0_25, %c0_26] : memref<32x256xbf16, #tpu.memory_space<vmem>>, vector<32x256xbf16>
    %cst_27 = arith.constant dense<0.000000e+00> : vector<32x64xf32>
    %47 = tpu.matmul %46, %45, %cst_27 {dimension_numbers = #tpu.dot_dimension_numbers<[1], [0], [0], [1], [0, 0, 1, 1], [], []>} : vector<32x256xbf16>, vector<256x64xbf16>, vector<32x64xf32> -> vector<32x64xf32>
    %48 = arith.truncf %47 : vector<32x64xf32> to vector<32x64xbf16>
    %c0_28 = arith.constant 0 : index
    %c0_29 = arith.constant 0 : index
    %49 = vector.load %arg11[%c0_28, %c0_29] : memref<64x128xbf16, #tpu.memory_space<vmem>>, vector<64x128xbf16>
    %cst_30 = arith.constant dense<0.000000e+00> : vector<32x128xf32>
    %50 = tpu.matmul %48, %49, %cst_30 {dimension_numbers = #tpu.dot_dimension_numbers<[1], [0], [0], [1], [0, 0, 1, 1], [], []>} : vector<32x64xbf16>, vector<64x128xbf16>, vector<32x128xf32> -> vector<32x128xf32>
    %c0_31 = arith.constant 0 : index
    %c0_32 = arith.constant 0 : index
    %51 = vector.load %arg12[%c0_31, %c0_32] : memref<1x128xf32, #tpu.memory_space<vmem>>, vector<1x128xf32>
    %52 = vector.broadcast %51 : vector<1x128xf32> to vector<32x128xf32>
    %53 = arith.addf %50, %52 : vector<32x128xf32>
    %54 = math.tanh %53 : vector<32x128xf32>
    %c0_33 = arith.constant 0 : index
    %c0_34 = arith.constant 0 : index
    %55 = vector.load %arg13[%c0_33, %c0_34] : memref<32x128xf32, #tpu.memory_space<vmem>>, vector<32x128xf32>
    tpu.vector_store %arg13[%c0_33, %c0_34], %54 {strides = array<i32>} : memref<32x128xf32, #tpu.memory_space<vmem>>, vector<32x128xf32>,
    return
  }
  func.func @transform_0(%arg0: i32) -> i32 {
    %c0_i32 = arith.constant 0 : i32
    %c0_i32_0 = arith.constant 0 : i32
    return %c0_i32 : i32
  }
  func.func @transform_1(%arg0: i32) -> (i32, i32) {
    %c0_i32 = arith.constant 0 : i32
    %c0_i32_0 = arith.constant 0 : i32
    return %arg0, %c0_i32 : i32, i32
  }
  func.func @transform_2(%arg0: i32) -> (i32, i32, i32) {
    %c0_i32 = arith.constant 0 : i32
    %c0_i32_0 = arith.constant 0 : i32
    %c0_i32_1 = arith.constant 0 : i32
    return %arg0, %c0_i32, %c0_i32_0 : i32, i32, i32
  }
  func.func @transform_3(%arg0: i32) -> (i32, i32) {
    %c0_i32 = arith.constant 0 : i32
    %c0_i32_0 = arith.constant 0 : i32
    %c0_i32_1 = arith.constant 0 : i32
    return %c0_i32, %c0_i32_0 : i32, i32
  }
  func.func @transform_4(%arg0: i32) -> (i32, i32) {
    %c0_i32 = arith.constant 0 : i32
    %c0_i32_0 = arith.constant 0 : i32
    %c0_i32_1 = arith.constant 0 : i32
    return %c0_i32, %c0_i32_0 : i32, i32
  }
  func.func @transform_5(%arg0: i32) -> (i32, i32) {
    %c0_i32 = arith.constant 0 : i32
    %c0_i32_0 = arith.constant 0 : i32
    %c0_i32_1 = arith.constant 0 : i32
    return %c0_i32, %c0_i32_0 : i32, i32
  }
  func.func @transform_6(%arg0: i32) -> (i32, i32) {
    %c0_i32 = arith.constant 0 : i32
    %c0_i32_0 = arith.constant 0 : i32
    %c0_i32_1 = arith.constant 0 : i32
    return %c0_i32, %c0_i32_0 : i32, i32
  }
  func.func @transform_7(%arg0: i32) -> (i32, i32) {
    %c0_i32 = arith.constant 0 : i32
    %c0_i32_0 = arith.constant 0 : i32
    %c0_i32_1 = arith.constant 0 : i32
    return %c0_i32, %c0_i32_0 : i32, i32
  }
  func.func @transform_8(%arg0: i32) -> (i32, i32) {
    %c0_i32 = arith.constant 0 : i32
    %c0_i32_0 = arith.constant 0 : i32
    %c0_i32_1 = arith.constant 0 : i32
    return %c0_i32, %c0_i32_0 : i32, i32
  }
  func.func @transform_9(%arg0: i32) -> (i32, i32) {
    %c0_i32 = arith.constant 0 : i32
    %c0_i32_0 = arith.constant 0 : i32
    %c0_i32_1 = arith.constant 0 : i32
    return %c0_i32, %c0_i32_0 : i32, i32
  }
  func.func @transform_10(%arg0: i32) -> (i32, i32) {
    %c0_i32 = arith.constant 0 : i32
    %c0_i32_0 = arith.constant 0 : i32
    %c0_i32_1 = arith.constant 0 : i32
    return %c0_i32, %c0_i32_0 : i32, i32
  }
  func.func @transform_11(%arg0: i32) -> (i32, i32) {
    %c0_i32 = arith.constant 0 : i32
    %c0_i32_0 = arith.constant 0 : i32
    %c0_i32_1 = arith.constant 0 : i32
    return %c0_i32, %c0_i32_0 : i32, i32
  }
  func.func @transform_12(%arg0: i32) -> (i32, i32) {
    %c0_i32 = arith.constant 0 : i32
    %c0_i32_0 = arith.constant 0 : i32
    return %arg0, %c0_i32 : i32, i32
  }
}

</mosaic_0001>

<bundles_post_ra>
// kernel: gin_net_forward.1
= control target key start
LH: loop header
LB: loop body
LE: loop exit
PB: predicated region body
PF: predicated region fallthrough
CT: control target
= control target key end

     0   :  { %17 = vsyncpa [#allocation3], 0  ;;  %s4234_s0 = inlined_call_operand.vmem [shape: f32[3], index: 0, kind: input, shape index: {}]   ;;  %s4235_s1 = inlined_call_operand.vmem [shape: f32[256,16], index: 1, kind: input, shape index: {}]   ;;  %s4236_s2 = inlined_call_operand.vmem [shape: bf16[1,256,256], index: 2, kind: input, shape index: {}]   ;;  %s4237_s3 = inlined_call_operand.vmem [shape: bf16[32,256], index: 3, kind: input, shape index: {}]   ;;  %s4238_s4 = inlined_call_operand.vmem [shape: bf16[16,64], index: 4, kind: input, shape index: {}]   ;;  %s4239_s5 = inlined_call_operand.vmem [shape: f32[1,64], index: 5, kind: input, shape index: {}]   ;;  %s4240_s6 = inlined_call_operand.vmem [shape: bf16[64,64], index: 6, kind: input, shape index: {}]   ;;  %s4241_s7 = inlined_call_operand.vmem [shape: f32[1,64], index: 7, kind: input, shape index: {}]   ;;  %s4242_s8 = inlined_call_operand.vmem [shape: bf16[64,64], index: 8, kind: input, shape index: {}]   ;;  %s4243_s9 = inlined_call_operand.vmem [shape: f32[1,64], index: 9, kind: input, shape index: {}]   ;;  %s4244_s10 = inlined_call_operand.vmem [shape: bf16[64,128], index: 10, kind: input, shape index: {}]   ;;  %s4245_s11 = inlined_call_operand.vmem [shape: f32[1,128], index: 11, kind: input, shape index: {}]   ;;  %s4246_s12 = inlined_call_operand.vmem [shape: f32[32,128], index: 12, kind: output, shape index: {}]  }
   0x1   :  { %s24_s23 = sshll.u32 %s4234_s0, 4  ;;  %s25_s23 = int_to_ptr.vmem [resolvable:$true] %s24_s23 }
   0x2   :  { %s2937_s24 = scalar_lea.vmem %s25_s23, 16  ;;  %p2942_p1 = scmp.lt.s32.totalorder %s25_s23, %s25_s23 }
   0x3   :  { %p2938_p0 = scmp.ne.s32.totalorder %s25_s23, %s2937_s24  ;;  %p2943_p2 = scmp.lt.s32.totalorder %s2937_s24, %s2937_s24 }
   0x5   :  { %p2944_p3 = por %p2943_p2, %p2942_p1 }
   0x7   :  { %p2945_p4 = pnand %p2944_p3, %p2938_p0 }
   0x9   :  { %2948 = shalt.err (!%p2945_p4)
}
   0xa   :  { %s2951_s25 = smov [#allocation2]  }
   0xb   :  { %27 = dma.vmem_to_smem %s25_s23, 16, %s2951_s25, [#allocation3]  }
   0xc   :  { %2949 = dma.done.wait [#allocation3], 16  }
   0xd   :  { %2950 = vsyncadd [#allocation3], 4294967280 }
   0xe   :  { %53 = sfence }
   0xf   :  { %v3023_v0 = vld [vmem:[%s4235_s1 + $0xf0] sm:$0xff]  ;;  %v3028_v1 = vld [vmem:[%s4235_s1 + $0xf8] sm:$0xff]  ;;  %v3045_v5 = vld [vmem:[%s4235_s1 + $0xe0] sm:$0xff]  ;;  %s135_s19 = sld [smem:[#allocation2]]  ;;  %vm522_vm0 = vcmask 130048   ;;  %vm1031_vm1 = vcmask 523264  }
  0x10   :  { %v3033_v2 = vld [vmem:[%s4235_s1 + $0x70] sm:$0xff]  ;;  %v134_v3 = vpack.c.bf16 %v3028_v1, %v3023_v0  ;;  %v3040_v4 = vld [vmem:[%s4235_s1 + $0x78] sm:$0xff]  ;;  %v3050_v6 = vld [vmem:[%s4235_s1 + $0xe8] sm:$0xff]  ;;  %s2029_s0 = sld [smem:[#allocation2 + $0x1]] }
  0x11   :  { %v126_v7 = vpack.c.bf16 %v3040_v4, %v3033_v2  ;;  %v133_v8 = vpack.c.bf16 %v3050_v6, %v3045_v5  ;;  %v3059_v9 = vld [vmem:[%s4235_s1 + $0x60] sm:$0xff]  ;;  %v3064_v10 = vld [vmem:[%s4235_s1 + $0x68] sm:$0xff]  ;;  %v3069_v11 = vld [vmem:[%s4235_s1 + $0xd0] sm:$0xff] }
  0x12   :  { %2084 = vmatprep.subr.bf16.mxu0 %v134_v3  ;;  %v3074_v12 = vld [vmem:[%s4235_s1 + $0xd8] sm:$0xff]  ;;  %v125_v13 = vpack.c.bf16 %v3064_v10, %v3059_v9  ;;  %v3083_v15 = vld [vmem:[%s4235_s1 + $0x50] sm:$0xff]  ;;  %v3093_v17 = vld [vmem:[%s4235_s1 + $0xc0] sm:$0xff] }
  0x13   :  { %2085 = vmatpush3.bf16.msra.mxu0 %v126_v7  ;;  %v132_v14 = vpack.c.bf16 %v3074_v12, %v3069_v11  ;;  %v3088_v16 = vld [vmem:[%s4235_s1 + $0x58] sm:$0xff]  ;;  %v3098_v18 = vld [vmem:[%s4235_s1 + $0xc8] sm:$0xff]  ;;  %v3107_v21 = vld [vmem:[%s4235_s1 + $0x40] sm:$0xff] }
  0x14   :  { %2086 = vmatprep.subr.bf16.mxu0 %v133_v8  ;;  %v124_v19 = vpack.c.bf16 %v3088_v16, %v3083_v15  ;;  %v131_v20 = vpack.c.bf16 %v3098_v18, %v3093_v17  ;;  %v3112_v22 = vld [vmem:[%s4235_s1 + $0x48] sm:$0xff]  ;;  %v3117_v23 = vld [vmem:[%s4235_s1 + $0xb0] sm:$0xff]  ;;  %v3122_v24 = vld [vmem:[%s4235_s1 + $0xb8] sm:$0xff] }
  0x15   :  { %v3127_v25 = vld [vmem:[%s4236_s2 + $0x4] ss:$8 sps:$4 sm:$0xff]   ;;  %v123_v26 = vpack.c.bf16 %v3112_v22, %v3107_v21  ;;  %v3134_v27 = vld [vmem:[%s4235_s1 + $0x30] sm:$0xff]  ;;  %v130_v28 = vpack.c.bf16 %v3122_v24, %v3117_v23  ;;  %v3141_v29 = vld [vmem:[%s4235_s1 + $0x38] sm:$0xff] }
  0x16   :  { %362 = vmatprep.mubr.bf16.mxu0 %v3127_v25  ;;  %v3147_v30 = vld [vmem:[%s4235_s1 + $0xa0] sm:$0xff]  ;;  %v3152_v31 = vld [vmem:[%s4235_s1 + $0xa8] sm:$0xff]  ;;  %v122_v32 = vpack.c.bf16 %v3141_v29, %v3134_v27  ;;  %v3171_v36 = vld [vmem:[%s4235_s1 + $0x90] sm:$0xff]  ;;  %s781_s29 = sadd.f32 1.0, %s2029_s0 }
  0x17   :  { %2087 = vmatpush3.bf16.msra.mxu0 %v125_v13  ;;  %v3159_v33 = vld [vmem:[%s4235_s1 + $0x20] sm:$0xff]  ;;  %v129_v34 = vpack.c.bf16 %v3152_v31, %v3147_v30  ;;  %v3166_v35 = vld [vmem:[%s4235_s1 + $0x28] sm:$0xff]  ;;  %v3176_v37 = vld [vmem:[%s4235_s1 + $0x98] sm:$0xff] }
  0x18   :  { %2088 = vmatprep.subr.bf16.mxu0 %v132_v14  ;;  %v121_v38 = vpack.c.bf16 %v3166_v35, %v3159_v33  ;;  %v3183_v39 = vld [vmem:[%s4235_s1 + $0x10] sm:$0xff]  ;;  %v128_v40 = vpack.c.bf16 %v3176_v37, %v3171_v36  ;;  %v3190_v41 = vld [vmem:[%s4235_s1 + $0x18] sm:$0xff]  ;;  %v3195_v42 = vld [vmem:[%s4235_s1 + $0x80] sm:$0xff] }
  0x19   :  { %v3200_v43 = vld [vmem:[%s4235_s1 + $0x88] sm:$0xff]  ;;  %v120_v44 = vpack.c.bf16 %v3190_v41, %v3183_v39  ;;  %v3207_v45 = vld [vmem:[%s4235_s1] sm:$0xff]  ;;  %v3226_v50 = vld [vmem:[%s4236_s2 + $0x14] ss:$8 sps:$4 sm:$0xff]  }
  0x1a   :  { %v127_v46 = vpack.c.bf16 %v3200_v43, %v3195_v42  ;;  %v3214_v47 = vld [vmem:[%s4235_s1 + $0x8] sm:$0xff]  ;;  %v3233_v51 = vld [vmem:[%s4236_s2 + $0x10] ss:$8 sps:$4 sm:$0xff]   ;;  %v3250_v54 = vld [vmem:[%s4236_s2 + $0x34] ss:$8 sps:$4 sm:$0xff]   ;;  %s136_s1 = sadd.f32 1.0, %s135_s19 }
  0x1b   :  { %2089 = vmatpush3.bf16.msra.mxu0 %v124_v19  ;;  %v119_v48 = vpack.c.bf16 %v3214_v47, %v3207_v45  ;;  %v3221_v49 = vld [vmem:[%s4236_s2] ss:$8 sps:$4 sm:$0xff]   ;;  %v3238_v52 = vld [vmem:[%s4236_s2 + $0x24] ss:$8 sps:$4 sm:$0xff]   ;;  %v3257_v55 = vld [vmem:[%s4236_s2 + $0x30] ss:$8 sps:$4 sm:$0xff]  }
  0x1c   :  { %2090 = vmatprep.subr.bf16.mxu0 %v131_v20  ;;  %v3245_v53 = vld [vmem:[%s4236_s2 + $0x20] ss:$8 sps:$4 sm:$0xff]   ;;  %v3262_v56 = vld [vmem:[%s4236_s2 + $0x44] ss:$8 sps:$4 sm:$0xff]   ;;  %v3274_v58 = vld [vmem:[%s4236_s2 + $0x54] ss:$8 sps:$4 sm:$0xff]  }
  0x1d   :  { %v3269_v57 = vld [vmem:[%s4236_s2 + $0x40] ss:$8 sps:$4 sm:$0xff]   ;;  %v3281_v59 = vld [vmem:[%s4236_s2 + $0x50] ss:$8 sps:$4 sm:$0xff]   ;;  %v3286_v60 = vld [vmem:[%s4236_s2 + $0x64] ss:$8 sps:$4 sm:$0xff]  }
  0x1e   :  { %v3293_v61 = vld [vmem:[%s4236_s2 + $0x60] ss:$8 sps:$4 sm:$0xff]   ;;  %v3298_v62 = vld [vmem:[%s4236_s2 + $0x74] ss:$8 sps:$4 sm:$0xff]   ;;  %v3305_v63 = vld [vmem:[%s4236_s2 + $0x70] ss:$8 sps:$4 sm:$0xff]  }
  0x1f   :  { %2091 = vmatpush3.bf16.msra.mxu0 %v123_v26  ;;  %4264 = vst [vmem:[#allocation5_spill] sm:$0xff] %v3305_v63  ;;  %v3310_v3 = vld [vmem:[%s4236_s2 + $0x84] ss:$8 sps:$4 sm:$0xff]   ;;  %v3317_v7 = vld [vmem:[%s4236_s2 + $0x80] ss:$8 sps:$4 sm:$0xff]  }
  0x20   :  { %2092 = vmatprep.subr.bf16.mxu0 %v130_v28  ;;  %4265 = vst [vmem:[#allocation6_spill] sm:$0xff] %v3310_v3  ;;  %4266 = vst [vmem:[#allocation7_spill] sm:$0xff] %v3317_v7  ;;  %v3322_v8 = vld [vmem:[%s4236_s2 + $0x94] ss:$8 sps:$4 sm:$0xff]   ;;  %v3329_v13 = vld [vmem:[%s4236_s2 + $0x90] ss:$8 sps:$4 sm:$0xff]  }
  0x21   :  { %4267 = vst [vmem:[#allocation8_spill] sm:$0xff] %v3322_v8  ;;  %4268 = vst [vmem:[#allocation9_spill] sm:$0xff] %v3329_v13  ;;  %v3334_v14 = vld [vmem:[%s4236_s2 + $0xa4] ss:$8 sps:$4 sm:$0xff]   ;;  %v3341_v19 = vld [vmem:[%s4236_s2 + $0xa0] ss:$8 sps:$4 sm:$0xff]  }
  0x22   :  { %4269 = vst [vmem:[#allocation10_spill] sm:$0xff] %v3334_v14  ;;  %4270 = vst [vmem:[#allocation11_spill] sm:$0xff] %v3341_v19  ;;  %v3346_v20 = vld [vmem:[%s4236_s2 + $0xb4] ss:$8 sps:$4 sm:$0xff]   ;;  %v2686_v26 = vld [vmem:[%s4238_s4] sm:$0xff]  }
  0x23   :  { %2093 = vmatpush3.bf16.msra.mxu0 %v122_v32  ;;  %4271 = vst [vmem:[#allocation12_spill] sm:$0xff] %v3346_v20  ;;  %2511 = vmatprep.subr.bf16.mxu1 %v2686_v26  ;;  %v3356_v28 = vld [vmem:[%s4236_s2 + $0xb0] ss:$8 sps:$4 sm:$0xff]   ;;  %v3361_v32 = vld [vmem:[%s4236_s2 + $0xc4] ss:$8 sps:$4 sm:$0xff]  }
  0x24   :  { %2094 = vmatprep.subr.bf16.mxu0 %v129_v34  ;;  %2512 = vmatpush3.bf16.msra.mxu1 %v2686_v26  ;;  %4272 = vst [vmem:[#allocation13_spill] sm:$0xff] %v3356_v28  ;;  %4273 = vst [vmem:[#allocation14_spill] sm:$0xff] %v3361_v32  ;;  %v3368_v34 = vld [vmem:[%s4236_s2 + $0xc0] ss:$8 sps:$4 sm:$0xff]   ;;  %v3404_v26 = vld [vmem:[%s4236_s2 + $0xf0] ss:$8 sps:$4 sm:$0xff]  }
  0x25   :  { %4274 = vst [vmem:[#allocation15_spill] sm:$0xff] %v3368_v34  ;;  %4280 = vst [vmem:[#allocation21_spill] sm:$0xff] %v3404_v26 }
  0x27   :  { %2095 = vmatpush3.bf16.msra.mxu0 %v121_v38  ;;  %v3373_v38 = vld [vmem:[%s4236_s2 + $0xd4] ss:$8 sps:$4 sm:$0xff]  }
  0x28   :  { %2096 = vmatprep.subr.bf16.mxu0 %v128_v40  ;;  %4275 = vst [vmem:[#allocation16_spill] sm:$0xff] %v3373_v38  ;;  %v3380_v40 = vld [vmem:[%s4236_s2 + $0xd0] ss:$8 sps:$4 sm:$0xff]  }
  0x29   :  { %4276 = vst [vmem:[#allocation17_spill] sm:$0xff] %v3380_v40 }
  0x2b   :  { %2097 = vmatpush3.bf16.msra.mxu0 %v120_v44  ;;  %v3385_v44 = vld [vmem:[%s4236_s2 + $0xe4] ss:$8 sps:$4 sm:$0xff]  }
  0x2c   :  { %2098 = vmatprep.subr.bf16.mxu0 %v127_v46  ;;  %4277 = vst [vmem:[#allocation18_spill] sm:$0xff] %v3385_v44  ;;  %v3392_v46 = vld [vmem:[%s4236_s2 + $0xe0] ss:$8 sps:$4 sm:$0xff]  }
  0x2d   :  { %4278 = vst [vmem:[#allocation19_spill] sm:$0xff] %v3392_v46 }
  0x2f   :  { %2099 = vmatpush3.bf16.msra.mxu0 %v119_v48  ;;  %v3397_v48 = vld [vmem:[%s4236_s2 + $0xf4] ss:$8 sps:$4 sm:$0xff]  }
  0x30   :  { %4279 = vst [vmem:[#allocation20_spill] sm:$0xff] %v3397_v48 }
  0x32   :  { %363 = vmatmul.mubr.bf16.vlgmr.msra.gmra.mxu0 %v3221_v49 }
  0x33   :  { %370 = vmatprep.mubr.bf16.mxu0 %v3226_v50 }
  0x3a   :  { %371 = vmatmul.mubr.bf16.gmra.mxu0 %v3233_v51 }
  0x3b   :  { %378 = vmatprep.mubr.bf16.mxu0 %v3238_v52 }
  0x42   :  { %379 = vmatmul.mubr.bf16.gmra.mxu0 %v3245_v53 }
  0x43   :  { %386 = vmatprep.mubr.bf16.mxu0 %v3250_v54 }
  0x4a   :  { %387 = vmatmul.mubr.bf16.gmra.mxu0 %v3257_v55 }
  0x4b   :  { %394 = vmatprep.mubr.bf16.mxu0 %v3262_v56 }
  0x52   :  { %395 = vmatmul.mubr.bf16.gmra.mxu0 %v3269_v57 }
  0x53   :  { %402 = vmatprep.mubr.bf16.mxu0 %v3274_v58 }
  0x5a   :  { %403 = vmatmul.mubr.bf16.gmra.mxu0 %v3281_v59 }
  0x5b   :  { %410 = vmatprep.mubr.bf16.mxu0 %v3286_v60 }
  0x62   :  { %411 = vmatmul.mubr.bf16.gmra.mxu0 %v3293_v61 }
  0x63   :  { %418 = vmatprep.mubr.bf16.mxu0 %v3298_v62 }
  0x6a   :  { %419 = vmatmul.mubr.bf16.gmra.mxu0 %v3305_v63 }
  0x6b   :  { %426 = vmatprep.mubr.bf16.mxu0 %v3310_v3 }
  0x72   :  { %427 = vmatmul.mubr.bf16.gmra.mxu0 %v3317_v7 }
  0x73   :  { %434 = vmatprep.mubr.bf16.mxu0 %v3322_v8 }
  0x7a   :  { %435 = vmatmul.mubr.bf16.gmra.mxu0 %v3329_v13 }
  0x7b   :  { %442 = vmatprep.mubr.bf16.mxu0 %v3334_v14 }
  0x82   :  { %443 = vmatmul.mubr.bf16.gmra.mxu0 %v3341_v19 }
  0x83   :  { %450 = vmatprep.mubr.bf16.mxu0 %v3346_v20 }
  0x8a   :  { %451 = vmatmul.mubr.bf16.gmra.mxu0 %v3356_v28 }
  0x8b   :  { %458 = vmatprep.mubr.bf16.mxu0 %v3361_v32 }
  0x92   :  { %459 = vmatmul.mubr.bf16.gmra.mxu0 %v3368_v34 }
  0x93   :  { %466 = vmatprep.mubr.bf16.mxu0 %v3373_v38 }
  0x9a   :  { %467 = vmatmul.mubr.bf16.gmra.mxu0 %v3380_v40  ;;  %v3407_v40 = vstv %s136_s1 }
  0x9b   :  { %474 = vmatprep.mubr.bf16.mxu0 %v3385_v44  ;;  %v138_v32 = vmul.f32 %v3407_v40, %v3207_v45  ;;  %v140_v3 = vmul.f32 %v3407_v40, %v3183_v39  ;;  %v141_v45 = vmul.f32 %v3407_v40, %v3190_v41  ;;  %v143_v39 = vmul.f32 %v3407_v40, %v3166_v35 }
  0xa2   :  { %475 = vmatmul.mubr.bf16.gmra.mxu0 %v3392_v46 }
  0xa3   :  { %482 = vmatprep.mubr.bf16.mxu0 %v3397_v48  ;;  %v139_v48 = vmul.f32 %v3407_v40, %v3214_v47 }
  0xaa   :  { %483 = vmatmul.mubr.bf16.gmra.mxu0 %v3404_v26 }
  0xf2   :  { %v2100_v44 = vpop.f32.mrf.mxu0 }
  0xf4   :  { %v2101_v38 = vpop.f32.mrf.mxu0 }
  0xf5   :  { %v2102_v46 = vadd.f32 %v2101_v38, %v2100_v44 }
  0xf6   :  { %v2103_v34 = vpop.f32.mrf.mxu0 }
  0xf7   :  { %v365_v14 = vadd.f32 %v2102_v46, %v138_v32 }
  0xf8   :  { %v2104_v28 = vpop.f32.mrf.mxu0 }
  0xf9   :  { %v2105_v20 = vadd.f32 %v2104_v28, %v2103_v34 }
  0xfa   :  { %v2106_v19 = vpop.f32.mrf.mxu0 }
  0xfb   :  { %v368_v13 = vadd.f32 %v2105_v20, %v139_v48 }
  0xfc   :  { %v2107_v26 = vpop.f32.mrf.mxu0 }
  0xfd   :  { %v491_v8 = vpack.c.bf16 %v368_v13, %v365_v14  ;;  %v2108_v63 = vadd.f32 %v2107_v26, %v2106_v19  ;;  %v142_v13 = vmul.f32 %v3407_v40, %v3159_v33  ;;  %v145_v33 = vmul.f32 %v3407_v40, %v3141_v29 }
  0xfe   :  { %v2109_v7 = vpop.f32.mrf.mxu0 }
  0xff   :  { %2513 = vmatprep.mubr.msk.bf16.mxu1 %vm522_vm0, %v491_v8  ;;  %v373_v28 = vadd.f32 %v2108_v63, %v140_v3 }
 0x100   :  { %v2110_v38 = vpop.f32.mrf.mxu0 }
 0x101   :  { %v2111_v47 = vadd.f32 %v2110_v38, %v2109_v7 }
 0x102   :  { %v2112_v44 = vpop.f32.mrf.mxu0 }
 0x103   :  { %v376_v34 = vadd.f32 %v2111_v47, %v141_v45  ;;  %v144_v45 = vmul.f32 %v3407_v40, %v3134_v27  ;;  %v147_v27 = vmul.f32 %v3407_v40, %v3112_v22 }
 0x104   :  { %v2113_v32 = vpop.f32.mrf.mxu0 }
 0x105   :  { %v492_v20 = vpack.c.bf16 %v376_v34, %v373_v28  ;;  %v2114_v14 = vadd.f32 %v2113_v32, %v2112_v44 }
 0x106   :  { %v2115_v46 = vpop.f32.mrf.mxu0 }
 0x107   :  { %2514 = vmatmul.mubr.msk.bf16.vlgmr.msra.gmra.mxu1 %vm522_vm0, %v492_v20  ;;  %v381_v48 = vadd.f32 %v2114_v14, %v142_v13  ;;  %v146_v13 = vmul.f32 %v3407_v40, %v3107_v21  ;;  %v149_v21 = vmul.f32 %v3407_v40, %v3088_v16 }
 0x108   :  { %v2116_v8 = vpop.f32.mrf.mxu0 }
 0x109   :  { %v2117_v19 = vadd.f32 %v2116_v8, %v2115_v46 }
 0x10a   :  { %v2118_v41 = vpop.f32.mrf.mxu0 }
 0x10b   :  { %v384_v7 = vadd.f32 %v2117_v19, %v143_v39 }
 0x10c   :  { %v2119_v26 = vpop.f32.mrf.mxu0 }
 0x10d   :  { %v493_v63 = vpack.c.bf16 %v384_v7, %v381_v48  ;;  %v2120_v38 = vadd.f32 %v2119_v26, %v2118_v41 }
 0x10e   :  { %v2121_v3 = vpop.f32.mrf.mxu0 }
 0x10f   :  { %2517 = vmatprep.mubr.msk.bf16.mxu1 %vm522_vm0, %v493_v63  ;;  %v389_v28 = vadd.f32 %v2120_v38, %v144_v45  ;;  %v148_v63 = vmul.f32 %v3407_v40, %v3083_v15  ;;  %v151_v15 = vmul.f32 %v3407_v40, %v3064_v10 }
 0x110   :  { %v2122_v47 = vpop.f32.mrf.mxu0 }
 0x111   :  { %v2123_v44 = vadd.f32 %v2122_v47, %v2121_v3 }
 0x112   :  { %v2124_v35 = vpop.f32.mrf.mxu0 }
 0x113   :  { %v392_v34 = vadd.f32 %v2123_v44, %v145_v33 }
 0x114   :  { %v2125_v32 = vpop.f32.mrf.mxu0 }
 0x115   :  { %v494_v20 = vpack.c.bf16 %v392_v34, %v389_v28  ;;  %v2126_v14 = vadd.f32 %v2125_v32, %v2124_v35  ;;  %v150_v34 = vmul.f32 %v3407_v40, %v3059_v9  ;;  %v153_v9 = vmul.f32 %v3407_v40, %v3040_v4 }
 0x116   :  { %v2127_v46 = vpop.f32.mrf.mxu0 }
 0x117   :  { %2518 = vmatmul.mubr.msk.bf16.gmra.mxu1 %vm522_vm0, %v494_v20  ;;  %v397_v19 = vadd.f32 %v2126_v14, %v146_v13 }
 0x118   :  { %v2128_v39 = vpop.f32.mrf.mxu0 }
 0x119   :  { %v2129_v8 = vadd.f32 %v2128_v39, %v2127_v46 }
 0x11a   :  { %v2130_v29 = vpop.f32.mrf.mxu0 }
 0x11b   :  { %v400_v41 = vadd.f32 %v2129_v8, %v147_v27 }
 0x11c   :  { %v2131_v48 = vpop.f32.mrf.mxu0 }
 0x11d   :  { %v495_v7 = vpack.c.bf16 %v400_v41, %v397_v19  ;;  %v2132_v3 = vadd.f32 %v2131_v48, %v2130_v29  ;;  %v152_v29 = vmul.f32 %v3407_v40, %v3033_v2  ;;  %v155_v2 = vmul.f32 %v3407_v40, %v3200_v43 }
 0x11e   :  { %v2133_v26 = vpop.f32.mrf.mxu0 }
 0x11f   :  { %2521 = vmatprep.mubr.msk.bf16.mxu1 %vm522_vm0, %v495_v7  ;;  %v405_v33 = vadd.f32 %v2132_v3, %v148_v63 }
 0x120   :  { %v2134_v45 = vpop.f32.mrf.mxu0 }
 0x121   :  { %v2135_v38 = vadd.f32 %v2134_v45, %v2133_v26  ;;  %v154_v45 = vmul.f32 %v3407_v40, %v3195_v42  ;;  %v157_v42 = vmul.f32 %v3407_v40, %v3176_v37 }
 0x122   :  { %v2136_v22 = vpop.f32.mrf.mxu0 }
 0x123   :  { %v408_v47 = vadd.f32 %v2135_v38, %v149_v21 }
 0x124   :  { %v2137_v44 = vpop.f32.mrf.mxu0 }
 0x125   :  { %v496_v35 = vpack.c.bf16 %v408_v47, %v405_v33  ;;  %v2138_v32 = vadd.f32 %v2137_v44, %v2136_v22 }
 0x126   :  { %v2139_v28 = vpop.f32.mrf.mxu0 }
 0x127   :  { %2522 = vmatmul.mubr.msk.bf16.gmra.mxu1 %vm522_vm0, %v496_v35  ;;  %v413_v13 = vadd.f32 %v2138_v32, %v150_v34  ;;  %v156_v32 = vmul.f32 %v3407_v40, %v3171_v36  ;;  %v159_v36 = vmul.f32 %v3407_v40, %v3152_v31 }
 0x128   :  { %v2140_v20 = vpop.f32.mrf.mxu0 }
 0x129   :  { %v2141_v46 = vadd.f32 %v2140_v20, %v2139_v28 }
 0x12a   :  { %v2142_v16 = vpop.f32.mrf.mxu0 }
 0x12b   :  { %v416_v14 = vadd.f32 %v2141_v46, %v151_v15 }
 0x12c   :  { %v2143_v27 = vpop.f32.mrf.mxu0 }
 0x12d   :  { %v497_v39 = vpack.c.bf16 %v416_v14, %v413_v13  ;;  %v2144_v19 = vadd.f32 %v2143_v27, %v2142_v16 }
 0x12e   :  { %v2145_v8 = vpop.f32.mrf.mxu0 }
 0x12f   :  { %2525 = vmatprep.mubr.msk.bf16.mxu1 %vm522_vm0, %v497_v39  ;;  %v421_v7 = vadd.f32 %v2144_v19, %v152_v29 }
 0x130   :  { %v2146_v41 = vpop.f32.mrf.mxu0 }
 0x131   :  { %v2147_v48 = vadd.f32 %v2146_v41, %v2145_v8  ;;  %v158_v8 = vmul.f32 %v3407_v40, %v3147_v30  ;;  %v161_v30 = vmul.f32 %v3407_v40, %v3122_v24 }
 0x132   :  { %v2148_v10 = vpop.f32.mrf.mxu0 }
 0x133   :  { %v424_v26 = vadd.f32 %v2147_v48, %v153_v9 }
 0x134   :  { %v2149_v63 = vpop.f32.mrf.mxu0 }
 0x135   :  { %v498_v3 = vpack.c.bf16 %v424_v26, %v421_v7  ;;  %v2150_v38 = vadd.f32 %v2149_v63, %v2148_v10  ;;  %v160_v63 = vmul.f32 %v3407_v40, %v3117_v23  ;;  %v163_v23 = vmul.f32 %v3407_v40, %v3098_v18 }
 0x136   :  { %v2151_v21 = vpop.f32.mrf.mxu0 }
 0x137   :  { %2526 = vmatmul.mubr.msk.bf16.gmra.mxu1 %vm522_vm0, %v498_v3  ;;  %v429_v47 = vadd.f32 %v2150_v38, %v154_v45 }
 0x138   :  { %v2152_v4 = vpop.f32.mrf.mxu0 }
 0x139   :  { %v2153_v22 = vadd.f32 %v2152_v4, %v2151_v21 }
 0x13a   :  { %v2154_v33 = vpop.f32.mrf.mxu0 }
 0x13b   :  { %v432_v44 = vadd.f32 %v2153_v22, %v155_v2 }
 0x13c   :  { %v2155_v35 = vpop.f32.mrf.mxu0 }
 0x13d   :  { %v499_v28 = vpack.c.bf16 %v432_v44, %v429_v47  ;;  %v2156_v15 = vadd.f32 %v2155_v35, %v2154_v33  ;;  %v162_v47 = vmul.f32 %v3407_v40, %v3093_v17  ;;  %v165_v17 = vmul.f32 %v3407_v40, %v3074_v12 }
 0x13e   :  { %v2157_v34 = vpop.f32.mrf.mxu0 }
 0x13f   :  { %2529 = vmatprep.mubr.msk.bf16.mxu1 %vm522_vm0, %v499_v28  ;;  %v437_v16 = vadd.f32 %v2156_v15, %v156_v32 }
 0x140   :  { %v2158_v20 = vpop.f32.mrf.mxu0 }
 0x141   :  { %v2159_v46 = vadd.f32 %v2158_v20, %v2157_v34 }
 0x142   :  { %v2160_v43 = vpop.f32.mrf.mxu0 }
 0x143   :  { %v440_v13 = vadd.f32 %v2159_v46, %v157_v42  ;;  %v164_v46 = vmul.f32 %v3407_v40, %v3069_v11  ;;  %v167_v11 = vmul.f32 %v3407_v40, %v3050_v6 }
 0x144   :  { %v2161_v14 = vpop.f32.mrf.mxu0 }
 0x145   :  { %v500_v27 = vpack.c.bf16 %v440_v13, %v437_v16  ;;  %v2162_v29 = vadd.f32 %v2161_v14, %v2160_v43 }
 0x146   :  { %v2163_v39 = vpop.f32.mrf.mxu0 }
 0x147   :  { %2530 = vmatmul.mubr.msk.bf16.gmra.mxu1 %vm522_vm0, %v500_v27  ;;  %v445_v41 = vadd.f32 %v2162_v29, %v158_v8 }
 0x148   :  { %v2164_v9 = vpop.f32.mrf.mxu0 }
 0x149   :  { %v2165_v19 = vadd.f32 %v2164_v9, %v2163_v39 }
 0x14a   :  { %v2166_v37 = vpop.f32.mrf.mxu0 }
 0x14b   :  { %v448_v48 = vadd.f32 %v2165_v19, %v159_v36  ;;  %v166_v36 = vmul.f32 %v3407_v40, %v3045_v5  ;;  %v169_v5 = vmul.f32 %v3407_v40, %v3028_v1 }
 0x14c   :  { %v2167_v10 = vpop.f32.mrf.mxu0 }
 0x14d   :  { %v501_v7 = vpack.c.bf16 %v448_v48, %v445_v41  ;;  %v2168_v3 = vadd.f32 %v2167_v10, %v2166_v37 }
 0x14e   :  { %v2169_v26 = vpop.f32.mrf.mxu0 }
 0x14f   :  { %2533 = vmatprep.mubr.msk.bf16.mxu1 %vm522_vm0, %v501_v7  ;;  %v453_v38 = vadd.f32 %v2168_v3, %v160_v63  ;;  %v168_v63 = vmul.f32 %v3407_v40, %v3023_v0 }
 0x150   :  { %v2170_v21 = vpop.f32.mrf.mxu0 }
 0x151   :  { %v2171_v45 = vadd.f32 %v2170_v21, %v2169_v26 }
 0x152   :  { %v2172_v31 = vpop.f32.mrf.mxu0 }
 0x153   :  { %v456_v2 = vadd.f32 %v2171_v45, %v161_v30 }
 0x154   :  { %v2173_v4 = vpop.f32.mrf.mxu0 }
 0x155   :  { %v502_v22 = vpack.c.bf16 %v456_v2, %v453_v38  ;;  %v2174_v44 = vadd.f32 %v2173_v4, %v2172_v31  ;;  %v3493_v38 = vld [vmem:[%s4239_s5] ss:$0 sm:$0xff] }
 0x156   :  { %v2175_v33 = vpop.f32.mrf.mxu0 }
 0x157   :  { %2534 = vmatmul.mubr.msk.bf16.gmra.mxu1 %vm522_vm0, %v502_v22  ;;  %v461_v34 = vadd.f32 %v2174_v44, %v162_v47 }
 0x158   :  { %v2176_v35 = vpop.f32.mrf.mxu0 }
 0x159   :  { %v2177_v28 = vadd.f32 %v2176_v35, %v2175_v33 }
 0x15a   :  { %v2178_v24 = vpop.f32.mrf.mxu0 }
 0x15b   :  { %v464_v32 = vadd.f32 %v2177_v28, %v163_v23 }
 0x15c   :  { %v2179_v15 = vpop.f32.mrf.mxu0 }
 0x15d   :  { %v503_v42 = vpack.c.bf16 %v464_v32, %v461_v34  ;;  %v2180_v43 = vadd.f32 %v2179_v15, %v2178_v24 }
 0x15e   :  { %v2181_v20 = vpop.f32.mrf.mxu0 }
 0x15f   :  { %2537 = vmatprep.mubr.msk.bf16.mxu1 %vm522_vm0, %v503_v42  ;;  %v469_v14 = vadd.f32 %v2180_v43, %v164_v46 }
 0x160   :  { %v2182_v16 = vpop.f32.mrf.mxu0 }
 0x161   :  { %v2183_v13 = vadd.f32 %v2182_v16, %v2181_v20 }
 0x162   :  { %v2184_v18 = vpop.f32.mrf.mxu0 }
 0x163   :  { %v472_v27 = vadd.f32 %v2183_v13, %v165_v17 }
 0x164   :  { %v2185_v39 = vpop.f32.mrf.mxu0 }
 0x165   :  { %v504_v8 = vpack.c.bf16 %v472_v27, %v469_v14  ;;  %v2186_v9 = vadd.f32 %v2185_v39, %v2184_v18 }
 0x166   :  { %v2187_v29 = vpop.f32.mrf.mxu0 }
 0x167   :  { %2538 = vmatmul.mubr.msk.bf16.gmra.mxu1 %vm522_vm0, %v504_v8  ;;  %v477_v41 = vadd.f32 %v2186_v9, %v166_v36 }
 0x168   :  { %v2188_v19 = vpop.f32.mrf.mxu0 }
 0x169   :  { %v2189_v37 = vadd.f32 %v2188_v19, %v2187_v29 }
 0x16a   :  { %v2190_v12 = vpop.f32.mrf.mxu0 }
 0x16b   :  { %v480_v48 = vadd.f32 %v2189_v37, %v167_v11 }
 0x16c   :  { %v2191_v10 = vpop.f32.mrf.mxu0 }
 0x16d   :  { %v505_v7 = vpack.c.bf16 %v480_v48, %v477_v41  ;;  %v2192_v3 = vadd.f32 %v2191_v10, %v2190_v12 }
 0x16e   :  { %v2193_v26 = vpop.f32.mrf.mxu0 }
 0x16f   :  { %2541 = vmatprep.mubr.msk.bf16.mxu1 %vm522_vm0, %v505_v7  ;;  %v485_v6 = vadd.f32 %v2192_v3, %v168_v63 }
 0x170   :  { %v2194_v30 = vpop.f32.mrf.mxu0 }
 0x171   :  { %v2195_v21 = vadd.f32 %v2194_v30, %v2193_v26 }
 0x173   :  { %v488_v45 = vadd.f32 %v2195_v21, %v169_v5 }
 0x175   :  { %v506_v31 = vpack.c.bf16 %v488_v45, %v485_v6 }
 0x177   :  { %2542 = vmatmul.mubr.msk.bf16.gmra.mxu1 %vm522_vm0, %v506_v31 }
 0x178   :  { %847 = vmatprep.mubr.bf16.mxu1 %v3127_v25 }
 0x1c7   :  { %v2515_v0 = vpop.f32.mrf.mxu1 }
 0x1c8   :  { %v614_v1 = vadd.f32 %v2515_v0, %v3493_v38 }
 0x1c9   :  { %v3496_v40 = vpop.f32.mrf.mxu1 }
 0x1ca   :  { %2705 = vtanh.f32 %v614_v1 }
 0x1cb   :  { %v2516_v2 = vpop.f32.mrf.mxu1 }
 0x1cc   :  { %v617_v4 = vadd.f32 %v2516_v2, %v3493_v38 }
 0x1cd   :  { %v3499_v22 = vpop.f32.mrf.mxu1 }
 0x1ce   :  { %2707 = vtanh.f32 %v617_v4 }
 0x1d7   :  { %v2519_v33 = vpop.f32.mrf.mxu1  ;;  %v3504_v44 = vpop.eup %2705 }
 0x1d8   :  { %v630_v25 = vadd.f32 %v2519_v33, %v3493_v38 }
 0x1d9   :  { %v3502_v47 = vpop.f32.mrf.mxu1 }
 0x1da   :  { %2709 = vtanh.f32 %v630_v25 }
 0x1db   :  { %v3506_v23 = vpop.eup %2707  ;;  %v2520_v35 = vpop.f32.mrf.mxu1 }
 0x1dc   :  { %v633_v28 = vadd.f32 %v2520_v35, %v3493_v38  ;;  %v765_v24 = vpack.c.bf16 %v3506_v23, %v3504_v44 }
 0x1dd   :  { %v3517_v42 = vpop.f32.mrf.mxu1 }
 0x1de   :  { %2711 = vtanh.f32 %v633_v28 }
 0x1e7   :  { %v3511_v34 = vpop.eup %2709  ;;  %v2523_v20 = vpop.f32.mrf.mxu1 }
 0x1e8   :  { %v646_v25 = vadd.f32 %v2523_v20, %v3493_v38 }
 0x1e9   :  { %v637_v46 = vpop.f32.mrf.mxu1 }
 0x1eb   :  { %v3513_v32 = vpop.eup %2711  ;;  %v2524_v43 = vpop.f32.mrf.mxu1 }
 0x1ec   :  { %v767_v15 = vpack.c.bf16 %v3513_v32, %v3511_v34  ;;  %v649_v4 = vadd.f32 %v2524_v43, %v3493_v38 }
 0x1ed   :  { %v640_v17 = vpop.f32.mrf.mxu1 }
 0x1ee   :  { %v641_v28 = vadd.f32 %v3493_v38, %v640_v17 }
 0x1f7   :  { %v2527_v16 = vpop.f32.mrf.mxu1 }
 0x1f8   :  { %v662_v10 = vadd.f32 %v2527_v16, %v3493_v38 }
 0x1f9   :  { %v653_v13 = vpop.f32.mrf.mxu1 }
 0x1fa   :  { %2713 = vtanh.f32 %v662_v10  ;;  %v654_v1 = vadd.f32 %v3493_v38, %v653_v13  ;;  %v638_v13 = vadd.f32 %v3493_v38, %v637_v46 }
 0x1fb   :  { %v2528_v18 = vpop.f32.mrf.mxu1 }
 0x1fc   :  { %v665_v26 = vadd.f32 %v2528_v18, %v3493_v38 }
 0x1fd   :  { %v656_v14 = vpop.f32.mrf.mxu1 }
 0x1fe   :  { %2715 = vtanh.f32 %v665_v26  ;;  %v657_v6 = vadd.f32 %v3493_v38, %v656_v14  ;;  %v622_v26 = vadd.f32 %v3493_v38, %v3502_v47 }
 0x207   :  { %v3519_v27 = vpop.f32.mrf.mxu1  ;;  %v3542_v43 = vpop.eup %2713 }
 0x209   :  { %v3521_v39 = vpop.f32.mrf.mxu1 }
 0x20b   :  { %v2532_v8 = vpop.f32.mrf.mxu1  ;;  %v3545_v14 = vpop.eup %2715 }
 0x20c   :  { %v681_v10 = vadd.f32 %v2532_v8, %v3493_v38 }
 0x20d   :  { %v3523_v29 = vpop.f32.mrf.mxu1 }
 0x20e   :  { %v673_v47 = vadd.f32 %v3493_v38, %v3523_v29 }
 0x217   :  { %v2535_v36 = vpop.f32.mrf.mxu1 }
 0x218   :  { %v694_v18 = vadd.f32 %v2535_v36, %v3493_v38 }
 0x219   :  { %v685_v9 = vpop.f32.mrf.mxu1 }
 0x21a   :  { %v686_v46 = vadd.f32 %v3493_v38, %v685_v9 }
 0x21b   :  { %v2536_v11 = vpop.f32.mrf.mxu1 }
 0x21c   :  { %v697_v16 = vadd.f32 %v2536_v11, %v3493_v38 }
 0x21d   :  { %v688_v19 = vpop.f32.mrf.mxu1 }
 0x227   :  { %v2539_v37 = vpop.f32.mrf.mxu1 }
 0x228   :  { %v710_v2 = vadd.f32 %v2539_v37, %v3493_v38  ;;  %v689_v37 = vadd.f32 %v3493_v38, %v688_v19 }
 0x229   :  { %v701_v12 = vpop.f32.mrf.mxu1 }
 0x22a   :  { %v702_v35 = vadd.f32 %v3493_v38, %v701_v12 }
 0x22b   :  { %v2540_v41 = vpop.f32.mrf.mxu1 }
 0x22c   :  { %v713_v31 = vadd.f32 %v2540_v41, %v3493_v38  ;;  %v625_v41 = vadd.f32 %v3493_v38, %v3517_v42  ;;  %v678_v42 = vadd.f32 %v3519_v27, %v3493_v38 }
 0x22d   :  { %v704_v48 = vpop.f32.mrf.mxu1 }
 0x22e   :  { %v705_v33 = vadd.f32 %v3493_v38, %v704_v48  ;;  %v771_v48 = vpack.c.bf16 %v3545_v14, %v3542_v43 }
 0x237   :  { %v2543_v7 = vpop.f32.mrf.mxu1 }
 0x238   :  { %v726_v63 = vadd.f32 %v2543_v7, %v3493_v38 }
 0x239   :  { %v717_v5 = vpop.f32.mrf.mxu1 }
 0x23a   :  { %v718_v3 = vadd.f32 %v3493_v38, %v717_v5  ;;  %2717 = vtanh.f32 %v726_v63 }
 0x23b   :  { %v2544_v30 = vpop.f32.mrf.mxu1 }
 0x23c   :  { %v729_v21 = vadd.f32 %v2544_v30, %v3493_v38 }
 0x23d   :  { %v720_v45 = vpop.f32.mrf.mxu1 }
 0x23e   :  { %2719 = vtanh.f32 %v729_v21  ;;  %v721_v0 = vadd.f32 %v3493_v38, %v720_v45 }
 0x23f   :  { %2721 = vtanh.f32 %v718_v3 }
 0x240   :  { %2723 = vtanh.f32 %v721_v0 }
 0x241   :  { %2725 = vtanh.f32 %v657_v6  ;;  %v670_v6 = vadd.f32 %v3493_v38, %v3521_v39  ;;  %v606_v39 = vadd.f32 %v3493_v38, %v3496_v40 }
 0x242   :  { %2727 = vtanh.f32 %v713_v31  ;;  %v609_v31 = vadd.f32 %v3493_v38, %v3499_v22 }
 0x243   :  { %2729 = vtanh.f32 %v654_v1 }
 0x244   :  { %2731 = vtanh.f32 %v710_v2 }
 0x245   :  { %2733 = vtanh.f32 %v649_v4 }
 0x246   :  { %2735 = vtanh.f32 %v705_v33 }
 0x247   :  { %2737 = vtanh.f32 %v646_v25  ;;  %v3547_v20 = vpop.eup %2717 }
 0x248   :  { %2739 = vtanh.f32 %v702_v35 }
 0x249   :  { %2741 = vtanh.f32 %v641_v28 }
 0x24a   :  { %2743 = vtanh.f32 %v697_v16 }
 0x24b   :  { %v3550_v17 = vpop.eup %2719  ;;  %2745 = vtanh.f32 %v638_v13 }
 0x24c   :  { %v3552_v11 = vpop.eup %2721  ;;  %2747 = vtanh.f32 %v694_v18  ;;  %v779_v36 = vpack.c.bf16 %v3550_v17, %v3547_v20 }
 0x24d   :  { %v3557_v12 = vpop.eup %2723  ;;  %2749 = vtanh.f32 %v689_v37 }
 0x24e   :  { %v3563_v19 = vpop.eup %2725  ;;  %2213 = vmatprep.subr.bf16.mxu1 %v779_v36  ;;  %v778_v9 = vpack.c.bf16 %v3557_v12, %v3552_v11  ;;  %2751 = vtanh.f32 %v686_v46 }
 0x24f   :  { %v3568_v7 = vpop.eup %2727  ;;  %2214 = vmatpush3.bf16.msra.mxu1 %v771_v48  ;;  %2753 = vtanh.f32 %v625_v41 }
 0x250   :  { %v3572_v63 = vpop.eup %2729  ;;  %2215 = vmatprep.subr.bf16.mxu1 %v778_v9  ;;  %2755 = vtanh.f32 %v681_v10 }
 0x251   :  { %v3576_v5 = vpop.eup %2731  ;;  %v770_v8 = vpack.c.bf16 %v3563_v19, %v3572_v63  ;;  %2757 = vtanh.f32 %v622_v26  ;;  %v4292_v26 = vld [vmem:[#allocation16_spill] sm:$0xff] }
 0x252   :  { %v3580_v3 = vpop.eup %2733  ;;  %v777_v30 = vpack.c.bf16 %v3568_v7, %v3576_v5  ;;  %2759 = vtanh.f32 %v678_v42  ;;  %v4293_v42 = vld [vmem:[#allocation17_spill] sm:$0xff] }
 0x253   :  { %v3586_v21 = vpop.eup %2735  ;;  %2216 = vmatpush3.bf16.msra.mxu1 %v770_v8  ;;  %2761 = vtanh.f32 %v673_v47  ;;  %v4294_v8 = vld [vmem:[#allocation18_spill] sm:$0xff]  ;;  %v4295_v47 = vld [vmem:[#allocation19_spill] sm:$0xff] }
 0x254   :  { %v3588_v27 = vpop.eup %2737  ;;  %2217 = vmatprep.subr.bf16.mxu1 %v777_v30  ;;  %2763 = vtanh.f32 %v670_v6  ;;  %v4296_v30 = vld [vmem:[#allocation20_spill] sm:$0xff]  ;;  %v4297_v6 = vld [vmem:[#allocation21_spill] sm:$0xff] }
 0x255   :  { %v3592_v45 = vpop.eup %2739  ;;  %v769_v29 = vpack.c.bf16 %v3580_v3, %v3588_v27  ;;  %2765 = vtanh.f32 %v609_v31  ;;  %v2905_v31 = vld [vmem:[%s4236_s2 + $0x4] ss:$8 sps:$4 sm:$0xff]  }
 0x256   :  { %v3598_v0 = vpop.eup %2741  ;;  %v776_v1 = vpack.c.bf16 %v3586_v21, %v3592_v45  ;;  %2767 = vtanh.f32 %v606_v39 }
 0x257   :  { %v3602_v2 = vpop.eup %2743  ;;  %2218 = vmatpush3.bf16.msra.mxu1 %v769_v29 }
 0x258   :  { %v3606_v4 = vpop.eup %2745  ;;  %2219 = vmatprep.subr.bf16.mxu1 %v776_v1 }
 0x259   :  { %v3608_v22 = vpop.eup %2747  ;;  %v768_v33 = vpack.c.bf16 %v3598_v0, %v3606_v4 }
 0x25a   :  { %v775_v25 = vpack.c.bf16 %v3602_v2, %v3608_v22  ;;  %v3614_v35 = vpop.eup %2749 }
 0x25b   :  { %2220 = vmatpush3.bf16.msra.mxu1 %v768_v33  ;;  %v3616_v38 = vpop.eup %2751 }
 0x25c   :  { %2221 = vmatprep.subr.bf16.mxu1 %v775_v25  ;;  %v3618_v40 = vpop.eup %2753  ;;  %v774_v28 = vpack.c.bf16 %v3614_v35, %v3616_v38  ;;  %v3690_v25 = vstv %s781_s29  ;;  %s2051_s29 = sld [smem:[#allocation2 + $0x2]] }
 0x25d   :  { %v3622_v16 = vpop.eup %2755 }
 0x25e   :  { %v3627_v13 = vpop.eup %2757 }
 0x25f   :  { %2222 = vmatpush3.bf16.msra.mxu1 %v767_v15  ;;  %v3629_v18 = vpop.eup %2759  ;;  %v766_v37 = vpack.c.bf16 %v3618_v40, %v3627_v13 }
 0x260   :  { %2223 = vmatprep.subr.bf16.mxu1 %v774_v28  ;;  %v773_v46 = vpack.c.bf16 %v3622_v16, %v3629_v18  ;;  %v3635_v36 = vpop.eup %2761 }
 0x261   :  { %v3637_v41 = vpop.eup %2763 }
 0x262   :  { %v2766_v48 = vpop.eup %2765  ;;  %v772_v15 = vpack.c.bf16 %v3635_v36, %v3637_v41  ;;  %s1290_s30 = sadd.f32 1.0, %s2051_s29 }
 0x263   :  { %2224 = vmatpush3.bf16.msra.mxu1 %v766_v37  ;;  %v2768_v10 = vpop.eup %2767 }
 0x264   :  { %2225 = vmatprep.subr.bf16.mxu1 %v773_v46  ;;  %v764_v9 = vpack.c.bf16 %v2766_v48, %v2768_v10  ;;  %v783_v37 = vmul.f32 %v2768_v10, %v3690_v25  ;;  %v784_v46 = vmul.f32 %v2766_v48, %v3690_v25  ;;  %v786_v10 = vmul.f32 %v3506_v23, %v3690_v25 }
 0x267   :  { %2226 = vmatpush3.bf16.msra.mxu1 %v765_v24  ;;  %v4291_v24 = vld [vmem:[#allocation15_spill] sm:$0xff] }
 0x268   :  { %2227 = vmatprep.subr.bf16.mxu1 %v772_v15 }
 0x26b   :  { %2228 = vmatpush3.bf16.msra.mxu1 %v764_v9 }
 0x26e   :  { %848 = vmatmul.mubr.bf16.vlgmr.msra.gmra.mxu1 %v3221_v49  ;;  %v4281_v49 = vld [vmem:[#allocation5_spill] sm:$0xff] }
 0x26f   :  { %855 = vmatprep.mubr.bf16.mxu1 %v3226_v50  ;;  %v4282_v50 = vld [vmem:[#allocation6_spill] sm:$0xff] }
 0x276   :  { %856 = vmatmul.mubr.bf16.gmra.mxu1 %v3233_v51  ;;  %v4283_v51 = vld [vmem:[#allocation7_spill] sm:$0xff] }
 0x277   :  { %863 = vmatprep.mubr.bf16.mxu1 %v3238_v52  ;;  %v4284_v52 = vld [vmem:[#allocation8_spill] sm:$0xff] }
 0x27e   :  { %864 = vmatmul.mubr.bf16.gmra.mxu1 %v3245_v53  ;;  %v2687_v53 = vld [vmem:[%s4240_s6 + $0x18] sm:$0xff]  }
 0x27f   :  { %871 = vmatprep.mubr.bf16.mxu1 %v3250_v54  ;;  %2545 = vmatprep.subr.bf16.mxu0 %v2687_v53  ;;  %v2688_v54 = vld [vmem:[%s4240_s6 + $0x10] sm:$0xff]  }
 0x280   :  { %2546 = vmatpush3.bf16.msra.mxu0 %v2687_v53 }
 0x281   :  { %2547 = vmatprep.subr.bf16.mxu0 %v2688_v54 }
 0x284   :  { %2548 = vmatpush3.bf16.msra.mxu0 %v2688_v54 }
 0x286   :  { %872 = vmatmul.mubr.bf16.gmra.mxu1 %v3257_v55  ;;  %v4285_v55 = vld [vmem:[#allocation9_spill] sm:$0xff] }
 0x287   :  { %879 = vmatprep.mubr.bf16.mxu1 %v3262_v56  ;;  %v4286_v56 = vld [vmem:[#allocation10_spill] sm:$0xff] }
 0x28e   :  { %880 = vmatmul.mubr.bf16.gmra.mxu1 %v3269_v57  ;;  %v2689_v57 = vld [vmem:[%s4240_s6 + $0x8] sm:$0xff]  }
 0x28f   :  { %887 = vmatprep.mubr.bf16.mxu1 %v3274_v58  ;;  %2549 = vmatprep.subr.bf16.mxu0 %v2689_v57  ;;  %v2690_v58 = vld [vmem:[%s4240_s6] sm:$0xff]  }
 0x290   :  { %2550 = vmatpush3.bf16.msra.mxu0 %v2689_v57 }
 0x291   :  { %2551 = vmatprep.subr.bf16.mxu0 %v2690_v58 }
 0x294   :  { %2552 = vmatpush3.bf16.msra.mxu0 %v2690_v58 }
 0x296   :  { %888 = vmatmul.mubr.bf16.gmra.mxu1 %v3281_v59  ;;  %v4287_v59 = vld [vmem:[#allocation11_spill] sm:$0xff] }
 0x297   :  { %895 = vmatprep.mubr.bf16.mxu1 %v3286_v60  ;;  %v4288_v60 = vld [vmem:[#allocation12_spill] sm:$0xff] }
 0x29e   :  { %896 = vmatmul.mubr.bf16.gmra.mxu1 %v3293_v61  ;;  %v4289_v61 = vld [vmem:[#allocation13_spill] sm:$0xff] }
 0x29f   :  { %903 = vmatprep.mubr.bf16.mxu1 %v3298_v62  ;;  %v4290_v62 = vld [vmem:[#allocation14_spill] sm:$0xff] }
 0x2a6   :  { %904 = vmatmul.mubr.bf16.gmra.mxu1 %v4281_v49 }
 0x2a7   :  { %911 = vmatprep.mubr.bf16.mxu1 %v4282_v50 }
 0x2ae   :  { %912 = vmatmul.mubr.bf16.gmra.mxu1 %v4283_v51 }
 0x2af   :  { %919 = vmatprep.mubr.bf16.mxu1 %v4284_v52 }
 0x2b6   :  { %920 = vmatmul.mubr.bf16.gmra.mxu1 %v4285_v55 }
 0x2b7   :  { %927 = vmatprep.mubr.bf16.mxu1 %v4286_v56  ;;  %v785_v56 = vmul.f32 %v3504_v44, %v3690_v25  ;;  %v788_v44 = vmul.f32 %v3618_v40, %v3690_v25 }
 0x2be   :  { %928 = vmatmul.mubr.bf16.gmra.mxu1 %v4287_v59 }
 0x2bf   :  { %935 = vmatprep.mubr.bf16.mxu1 %v4288_v60 }
 0x2c6   :  { %936 = vmatmul.mubr.bf16.gmra.mxu1 %v4289_v61 }
 0x2c7   :  { %943 = vmatprep.mubr.bf16.mxu1 %v4290_v62 }
 0x2ce   :  { %944 = vmatmul.mubr.bf16.gmra.mxu1 %v4291_v24 }
 0x2cf   :  { %951 = vmatprep.mubr.bf16.mxu1 %v4292_v26 }
 0x2d6   :  { %952 = vmatmul.mubr.bf16.gmra.mxu1 %v4293_v42  ;;  %v787_v42 = vmul.f32 %v3627_v13, %v3690_v25  ;;  %v790_v13 = vmul.f32 %v3513_v32, %v3690_v25 }
 0x2d7   :  { %959 = vmatprep.mubr.bf16.mxu1 %v4294_v8 }
 0x2de   :  { %960 = vmatmul.mubr.bf16.gmra.mxu1 %v4295_v47 }
 0x2df   :  { %967 = vmatprep.mubr.bf16.mxu1 %v4296_v30 }
 0x2e6   :  { %968 = vmatmul.mubr.bf16.gmra.mxu1 %v4297_v6 }
 0x2e7   :  { %1356 = vmatprep.mubr.bf16.mxu1 %v2905_v31 }
 0x32e   :  { %v2229_v29 = vpop.f32.mrf.mxu1 }
 0x330   :  { %v2230_v1 = vpop.f32.mrf.mxu1 }
 0x331   :  { %v2231_v33 = vadd.f32 %v2230_v1, %v2229_v29 }
 0x332   :  { %v2232_v39 = vpop.f32.mrf.mxu1 }
 0x333   :  { %v850_v49 = vadd.f32 %v2231_v33, %v783_v37  ;;  %v789_v33 = vmul.f32 %v3511_v34, %v3690_v25  ;;  %v792_v34 = vmul.f32 %v3598_v0, %v3690_v25 }
 0x334   :  { %v2233_v28 = vpop.f32.mrf.mxu1 }
 0x335   :  { %v2234_v15 = vadd.f32 %v2233_v28, %v2232_v39 }
 0x336   :  { %v2235_v9 = vpop.f32.mrf.mxu1 }
 0x337   :  { %v853_v50 = vadd.f32 %v2234_v15, %v784_v46 }
 0x338   :  { %v2236_v51 = vpop.f32.mrf.mxu1 }
 0x339   :  { %v976_v52 = vpack.c.bf16 %v853_v50, %v850_v49  ;;  %v2237_v54 = vadd.f32 %v2236_v51, %v2235_v9 }
 0x33a   :  { %v2238_v53 = vpop.f32.mrf.mxu1 }
 0x33b   :  { %2553 = vmatprep.mubr.msk.bf16.mxu0 %vm1031_vm1, %v976_v52  ;;  %v858_v58 = vadd.f32 %v2237_v54, %v785_v56  ;;  %v791_v52 = vmul.f32 %v3606_v4, %v3690_v25  ;;  %v794_v4 = vmul.f32 %v3580_v3, %v3690_v25 }
 0x33c   :  { %v2239_v55 = vpop.f32.mrf.mxu1 }
 0x33d   :  { %v2240_v57 = vadd.f32 %v2239_v55, %v2238_v53 }
 0x33e   :  { %v2241_v48 = vpop.f32.mrf.mxu1 }
 0x33f   :  { %v861_v59 = vadd.f32 %v2240_v57, %v786_v10 }
 0x340   :  { %v2242_v60 = vpop.f32.mrf.mxu1 }
 0x341   :  { %v977_v61 = vpack.c.bf16 %v861_v59, %v858_v58  ;;  %v2243_v24 = vadd.f32 %v2242_v60, %v2241_v48  ;;  %v793_v59 = vmul.f32 %v3588_v27, %v3690_v25  ;;  %v796_v27 = vmul.f32 %v3563_v19, %v3690_v25 }
 0x342   :  { %v2244_v62 = vpop.f32.mrf.mxu1 }
 0x343   :  { %2554 = vmatmul.mubr.msk.bf16.vlgmr.msra.gmra.mxu0 %vm1031_vm1, %v977_v61  ;;  %v866_v23 = vadd.f32 %v2243_v24, %v787_v42 }
 0x344   :  { %v2245_v26 = vpop.f32.mrf.mxu1 }
 0x345   :  { %v2246_v8 = vadd.f32 %v2245_v26, %v2244_v62 }
 0x346   :  { %v2247_v47 = vpop.f32.mrf.mxu1 }
 0x347   :  { %v869_v30 = vadd.f32 %v2246_v8, %v788_v44 }
 0x348   :  { %v2248_v6 = vpop.f32.mrf.mxu1 }
 0x349   :  { %v978_v31 = vpack.c.bf16 %v869_v30, %v866_v23  ;;  %v2249_v1 = vadd.f32 %v2248_v6, %v2247_v47  ;;  %v795_v47 = vmul.f32 %v3572_v63, %v3690_v25  ;;  %v798_v63 = vmul.f32 %v3545_v14, %v3690_v25 }
 0x34a   :  { %v2250_v29 = vpop.f32.mrf.mxu1 }
 0x34b   :  { %2557 = vmatprep.mubr.msk.bf16.mxu0 %vm1031_vm1, %v978_v31  ;;  %v874_v40 = vadd.f32 %v2249_v1, %v789_v33 }
 0x34c   :  { %v2251_v39 = vpop.f32.mrf.mxu1 }
 0x34d   :  { %v2252_v28 = vadd.f32 %v2251_v39, %v2250_v29 }
 0x34e   :  { %v2253_v37 = vpop.f32.mrf.mxu1 }
 0x34f   :  { %v877_v46 = vadd.f32 %v2252_v28, %v790_v13  ;;  %v797_v13 = vmul.f32 %v3542_v43, %v3690_v25  ;;  %v800_v43 = vmul.f32 %v3635_v36, %v3690_v25 }
 0x350   :  { %v2254_v15 = vpop.f32.mrf.mxu1 }
 0x351   :  { %v979_v9 = vpack.c.bf16 %v877_v46, %v874_v40  ;;  %v2255_v50 = vadd.f32 %v2254_v15, %v2253_v37 }
 0x352   :  { %v2256_v49 = vpop.f32.mrf.mxu1 }
 0x353   :  { %2558 = vmatmul.mubr.msk.bf16.gmra.mxu0 %vm1031_vm1, %v979_v9  ;;  %v882_v32 = vadd.f32 %v2255_v50, %v791_v52 }
 0x354   :  { %v2257_v51 = vpop.f32.mrf.mxu1 }
 0x355   :  { %v2258_v53 = vadd.f32 %v2257_v51, %v2256_v49  ;;  %v799_v51 = vmul.f32 %v3637_v41, %v3690_v25  ;;  %v802_v41 = vmul.f32 %v3622_v16, %v3690_v25 }
 0x356   :  { %v2259_v54 = vpop.f32.mrf.mxu1 }
 0x357   :  { %v885_v55 = vadd.f32 %v2258_v53, %v792_v34 }
 0x358   :  { %v2260_v56 = vpop.f32.mrf.mxu1 }
 0x359   :  { %v980_v10 = vpack.c.bf16 %v885_v55, %v882_v32  ;;  %v2261_v48 = vadd.f32 %v2260_v56, %v2259_v54 }
 0x35a   :  { %v2262_v57 = vpop.f32.mrf.mxu1 }
 0x35b   :  { %2561 = vmatprep.mubr.msk.bf16.mxu0 %vm1031_vm1, %v980_v10  ;;  %v890_v0 = vadd.f32 %v2261_v48, %v793_v59 }
 0x35c   :  { %v2263_v58 = vpop.f32.mrf.mxu1 }
 0x35d   :  { %v2264_v60 = vadd.f32 %v2263_v58, %v2262_v57  ;;  %v801_v57 = vmul.f32 %v3629_v18, %v3690_v25  ;;  %v804_v18 = vmul.f32 %v3614_v35, %v3690_v25 }
 0x35e   :  { %v2265_v61 = vpop.f32.mrf.mxu1 }
 0x35f   :  { %v893_v62 = vadd.f32 %v2264_v60, %v794_v4 }
 0x360   :  { %v2266_v24 = vpop.f32.mrf.mxu1 }
 0x361   :  { %v981_v26 = vpack.c.bf16 %v893_v62, %v890_v0  ;;  %v2267_v44 = vadd.f32 %v2266_v24, %v2265_v61  ;;  %v803_v24 = vmul.f32 %v3616_v38, %v3690_v25  ;;  %v806_v38 = vmul.f32 %v3602_v2, %v3690_v25 }
 0x362   :  { %v2268_v42 = vpop.f32.mrf.mxu1 }
 0x363   :  { %2562 = vmatmul.mubr.msk.bf16.gmra.mxu0 %vm1031_vm1, %v981_v26  ;;  %v898_v3 = vadd.f32 %v2267_v44, %v795_v47 }
 0x364   :  { %v2269_v8 = vpop.f32.mrf.mxu1 }
 0x365   :  { %v2270_v23 = vadd.f32 %v2269_v8, %v2268_v42 }
 0x366   :  { %v2271_v30 = vpop.f32.mrf.mxu1 }
 0x367   :  { %v901_v6 = vadd.f32 %v2270_v23, %v796_v27 }
 0x368   :  { %v2272_v31 = vpop.f32.mrf.mxu1 }
 0x369   :  { %v982_v29 = vpack.c.bf16 %v901_v6, %v898_v3  ;;  %v2273_v39 = vadd.f32 %v2272_v31, %v2271_v30  ;;  %v805_v3 = vmul.f32 %v3608_v22, %v3690_v25  ;;  %v808_v22 = vmul.f32 %v3586_v21, %v3690_v25 }
 0x36a   :  { %v2274_v1 = vpop.f32.mrf.mxu1 }
 0x36b   :  { %2565 = vmatprep.mubr.msk.bf16.mxu0 %vm1031_vm1, %v982_v29  ;;  %v906_v19 = vadd.f32 %v2273_v39, %v797_v13 }
 0x36c   :  { %v2275_v33 = vpop.f32.mrf.mxu1 }
 0x36d   :  { %v2276_v28 = vadd.f32 %v2275_v33, %v2274_v1 }
 0x36e   :  { %v2277_v37 = vpop.f32.mrf.mxu1 }
 0x36f   :  { %v909_v40 = vadd.f32 %v2276_v28, %v798_v63  ;;  %v807_v28 = vmul.f32 %v3592_v45, %v3690_v25  ;;  %v810_v45 = vmul.f32 %v3568_v7, %v3690_v25 }
 0x370   :  { %v2278_v46 = vpop.f32.mrf.mxu1 }
 0x371   :  { %v983_v15 = vpack.c.bf16 %v909_v40, %v906_v19  ;;  %v2279_v49 = vadd.f32 %v2278_v46, %v2277_v37 }
 0x372   :  { %v2280_v9 = vpop.f32.mrf.mxu1 }
 0x373   :  { %2566 = vmatmul.mubr.msk.bf16.gmra.mxu0 %vm1031_vm1, %v983_v15  ;;  %v914_v14 = vadd.f32 %v2279_v49, %v799_v51  ;;  %v809_v51 = vmul.f32 %v3576_v5, %v3690_v25  ;;  %v812_v5 = vmul.f32 %v3557_v12, %v3690_v25 }
 0x374   :  { %v2281_v50 = vpop.f32.mrf.mxu1 }
 0x375   :  { %v2282_v52 = vadd.f32 %v2281_v50, %v2280_v9 }
 0x376   :  { %v2283_v34 = vpop.f32.mrf.mxu1 }
 0x377   :  { %v917_v53 = vadd.f32 %v2282_v52, %v800_v43 }
 0x378   :  { %v2284_v54 = vpop.f32.mrf.mxu1 }
 0x379   :  { %v984_v32 = vpack.c.bf16 %v917_v53, %v914_v14  ;;  %v2285_v56 = vadd.f32 %v2284_v54, %v2283_v34 }
 0x37a   :  { %v2286_v55 = vpop.f32.mrf.mxu1 }
 0x37b   :  { %2569 = vmatprep.mubr.msk.bf16.mxu0 %vm1031_vm1, %v984_v32  ;;  %v922_v36 = vadd.f32 %v2285_v56, %v801_v57  ;;  %v811_v56 = vmul.f32 %v3552_v11, %v3690_v25  ;;  %v814_v11 = vmul.f32 %v3550_v17, %v3690_v25 }
 0x37c   :  { %v2287_v10 = vpop.f32.mrf.mxu1 }
 0x37d   :  { %v2288_v48 = vadd.f32 %v2287_v10, %v2286_v55 }
 0x37e   :  { %v2289_v58 = vpop.f32.mrf.mxu1 }
 0x37f   :  { %v925_v59 = vadd.f32 %v2288_v48, %v802_v41 }
 0x380   :  { %v2290_v4 = vpop.f32.mrf.mxu1 }
 0x381   :  { %v985_v60 = vpack.c.bf16 %v925_v59, %v922_v36  ;;  %v2291_v0 = vadd.f32 %v2290_v4, %v2289_v58 }
 0x382   :  { %v2292_v61 = vpop.f32.mrf.mxu1 }
 0x383   :  { %2570 = vmatmul.mubr.msk.bf16.gmra.mxu0 %vm1031_vm1, %v985_v60  ;;  %v930_v16 = vadd.f32 %v2291_v0, %v803_v24  ;;  %v813_v60 = vmul.f32 %v3547_v20, %v3690_v25  ;;  %v3773_v24 = vld [vmem:[%s4241_s7] ss:$0 sm:$0xff] }
 0x384   :  { %v2293_v62 = vpop.f32.mrf.mxu1 }
 0x385   :  { %v2294_v26 = vadd.f32 %v2293_v62, %v2292_v61 }
 0x386   :  { %v2295_v42 = vpop.f32.mrf.mxu1 }
 0x387   :  { %v933_v44 = vadd.f32 %v2294_v26, %v804_v18 }
 0x388   :  { %v2296_v8 = vpop.f32.mrf.mxu1 }
 0x389   :  { %v986_v47 = vpack.c.bf16 %v933_v44, %v930_v16  ;;  %v2297_v23 = vadd.f32 %v2296_v8, %v2295_v42 }
 0x38a   :  { %v2298_v27 = vpop.f32.mrf.mxu1 }
 0x38b   :  { %2573 = vmatprep.mubr.msk.bf16.mxu0 %vm1031_vm1, %v986_v47  ;;  %v938_v35 = vadd.f32 %v2297_v23, %v805_v3 }
 0x38c   :  { %v2299_v30 = vpop.f32.mrf.mxu1 }
 0x38d   :  { %v2300_v6 = vadd.f32 %v2299_v30, %v2298_v27 }
 0x38e   :  { %v2301_v31 = vpop.f32.mrf.mxu1 }
 0x38f   :  { %v941_v29 = vadd.f32 %v2300_v6, %v806_v38 }
 0x390   :  { %v2302_v1 = vpop.f32.mrf.mxu1 }
 0x391   :  { %v987_v39 = vpack.c.bf16 %v941_v29, %v938_v35  ;;  %v2303_v13 = vadd.f32 %v2302_v1, %v2301_v31 }
 0x392   :  { %v2304_v33 = vpop.f32.mrf.mxu1 }
 0x393   :  { %2574 = vmatmul.mubr.msk.bf16.gmra.mxu0 %vm1031_vm1, %v987_v39  ;;  %v946_v2 = vadd.f32 %v2303_v13, %v807_v28 }
 0x394   :  { %v2305_v63 = vpop.f32.mrf.mxu1 }
 0x395   :  { %v2306_v37 = vadd.f32 %v2305_v63, %v2304_v33 }
 0x396   :  { %v2307_v19 = vpop.f32.mrf.mxu1 }
 0x397   :  { %v949_v40 = vadd.f32 %v2306_v37, %v808_v22 }
 0x398   :  { %v2308_v46 = vpop.f32.mrf.mxu1 }
 0x399   :  { %v988_v15 = vpack.c.bf16 %v949_v40, %v946_v2  ;;  %v2309_v49 = vadd.f32 %v2308_v46, %v2307_v19 }
 0x39a   :  { %v2310_v9 = vpop.f32.mrf.mxu1 }
 0x39b   :  { %2577 = vmatprep.mubr.msk.bf16.mxu0 %vm1031_vm1, %v988_v15  ;;  %v954_v21 = vadd.f32 %v2309_v49, %v809_v51 }
 0x39c   :  { %v2311_v50 = vpop.f32.mrf.mxu1 }
 0x39d   :  { %v2312_v43 = vadd.f32 %v2311_v50, %v2310_v9 }
 0x39e   :  { %v2313_v52 = vpop.f32.mrf.mxu1 }
 0x39f   :  { %v957_v34 = vadd.f32 %v2312_v43, %v810_v45 }
 0x3a0   :  { %v2314_v14 = vpop.f32.mrf.mxu1 }
 0x3a1   :  { %v989_v53 = vpack.c.bf16 %v957_v34, %v954_v21  ;;  %v2315_v32 = vadd.f32 %v2314_v14, %v2313_v52 }
 0x3a2   :  { %v2316_v54 = vpop.f32.mrf.mxu1 }
 0x3a3   :  { %2578 = vmatmul.mubr.msk.bf16.gmra.mxu0 %vm1031_vm1, %v989_v53  ;;  %v962_v7 = vadd.f32 %v2315_v32, %v811_v56 }
 0x3a4   :  { %v2317_v55 = vpop.f32.mrf.mxu1 }
 0x3a5   :  { %v2318_v10 = vadd.f32 %v2317_v55, %v2316_v54 }
 0x3a6   :  { %v2319_v57 = vpop.f32.mrf.mxu1 }
 0x3a7   :  { %v965_v41 = vadd.f32 %v2318_v10, %v812_v5 }
 0x3a8   :  { %v2320_v48 = vpop.f32.mrf.mxu1 }
 0x3a9   :  { %v990_v58 = vpack.c.bf16 %v965_v41, %v962_v7  ;;  %v2321_v59 = vadd.f32 %v2320_v48, %v2319_v57 }
 0x3aa   :  { %v2322_v36 = vpop.f32.mrf.mxu1 }
 0x3ab   :  { %2581 = vmatprep.mubr.msk.bf16.mxu0 %vm1031_vm1, %v990_v58  ;;  %v970_v0 = vadd.f32 %v2321_v59, %v813_v60 }
 0x3ac   :  { %v2323_v4 = vpop.f32.mrf.mxu1 }
 0x3ad   :  { %v2324_v61 = vadd.f32 %v2323_v4, %v2322_v36 }
 0x3af   :  { %v973_v12 = vadd.f32 %v2324_v61, %v814_v11 }
 0x3b1   :  { %v991_v62 = vpack.c.bf16 %v973_v12, %v970_v0 }
 0x3b3   :  { %2582 = vmatmul.mubr.msk.bf16.gmra.mxu0 %vm1031_vm1, %v991_v62 }
 0x403   :  { %v2555_v18 = vpop.f32.mrf.mxu0 }
 0x404   :  { %v1123_v26 = vadd.f32 %v2555_v18, %v3773_v24 }
 0x405   :  { %v1114_v42 = vpop.f32.mrf.mxu0 }
 0x406   :  { %v1115_v20 = vadd.f32 %v3773_v24, %v1114_v42  ;;  %2769 = vtanh.f32 %v1123_v26 }
 0x407   :  { %v2556_v16 = vpop.f32.mrf.mxu0 }
 0x408   :  { %v1126_v17 = vadd.f32 %v2556_v16, %v3773_v24 }
 0x409   :  { %v1117_v25 = vpop.f32.mrf.mxu0 }
 0x40a   :  { %2771 = vtanh.f32 %v1126_v17  ;;  %v1118_v44 = vadd.f32 %v3773_v24, %v1117_v25 }
 0x40b   :  { %2773 = vtanh.f32 %v1115_v20 }
 0x40c   :  { %2775 = vtanh.f32 %v1118_v44 }
 0x413   :  { %v2559_v8 = vpop.f32.mrf.mxu0  ;;  %v3780_v23 = vpop.eup %2769 }
 0x414   :  { %v1139_v47 = vadd.f32 %v2559_v8, %v3773_v24 }
 0x415   :  { %v1130_v27 = vpop.f32.mrf.mxu0 }
 0x416   :  { %v1131_v3 = vadd.f32 %v3773_v24, %v1130_v27  ;;  %2777 = vtanh.f32 %v1139_v47 }
 0x417   :  { %v3782_v30 = vpop.eup %2771  ;;  %v2560_v38 = vpop.f32.mrf.mxu0 }
 0x418   :  { %v3785_v6 = vpop.eup %2773  ;;  %v1142_v31 = vadd.f32 %v2560_v38, %v3773_v24  ;;  %v1274_v35 = vpack.c.bf16 %v3782_v30, %v3780_v23 }
 0x419   :  { %v3790_v29 = vpop.eup %2775  ;;  %v1133_v1 = vpop.f32.mrf.mxu0 }
 0x41a   :  { %2779 = vtanh.f32 %v1142_v31  ;;  %v1134_v39 = vadd.f32 %v3773_v24, %v1133_v1  ;;  %v1273_v33 = vpack.c.bf16 %v3790_v29, %v3785_v6 }
 0x41b   :  { %2781 = vtanh.f32 %v1131_v3 }
 0x41c   :  { %2783 = vtanh.f32 %v1134_v39 }
 0x423   :  { %v3795_v13 = vpop.eup %2777  ;;  %v2563_v2 = vpop.f32.mrf.mxu0 }
 0x424   :  { %v1155_v26 = vadd.f32 %v2563_v2, %v3773_v24 }
 0x425   :  { %v1146_v40 = vpop.f32.mrf.mxu0 }
 0x426   :  { %v1147_v17 = vadd.f32 %v3773_v24, %v1146_v40 }
 0x427   :  { %v3797_v63 = vpop.eup %2779  ;;  %v2564_v46 = vpop.f32.mrf.mxu0 }
 0x428   :  { %v3799_v28 = vpop.eup %2781  ;;  %v1276_v22 = vpack.c.bf16 %v3797_v63, %v3795_v13  ;;  %v1158_v62 = vadd.f32 %v2564_v46, %v3773_v24 }
 0x429   :  { %v3803_v37 = vpop.eup %2783  ;;  %v1149_v15 = vpop.f32.mrf.mxu0 }
 0x42a   :  { %v1275_v19 = vpack.c.bf16 %v3803_v37, %v3799_v28  ;;  %v1150_v20 = vadd.f32 %v3773_v24, %v1149_v15 }
 0x433   :  { %v2567_v9 = vpop.f32.mrf.mxu0 }
 0x434   :  { %v1171_v10 = vadd.f32 %v2567_v9, %v3773_v24 }
 0x435   :  { %v1162_v49 = vpop.f32.mrf.mxu0 }
 0x436   :  { %2785 = vtanh.f32 %v1171_v10  ;;  %v1163_v0 = vadd.f32 %v3773_v24, %v1162_v49 }
 0x437   :  { %v2568_v50 = vpop.f32.mrf.mxu0 }
 0x438   :  { %v1174_v7 = vadd.f32 %v2568_v50, %v3773_v24 }
 0x439   :  { %v1165_v51 = vpop.f32.mrf.mxu0 }
 0x43a   :  { %2787 = vtanh.f32 %v1174_v7  ;;  %v1166_v4 = vadd.f32 %v3773_v24, %v1165_v51 }
 0x443   :  { %v3807_v45 = vpop.f32.mrf.mxu0  ;;  %v3830_v25 = vpop.eup %2785 }
 0x444   :  { %v1187_v50 = vadd.f32 %v3807_v45, %v3773_v24 }
 0x445   :  { %v3809_v43 = vpop.f32.mrf.mxu0 }
 0x447   :  { %v2572_v52 = vpop.f32.mrf.mxu0  ;;  %v3833_v8 = vpop.eup %2787 }
 0x448   :  { %v1280_v2 = vpack.c.bf16 %v3833_v8, %v3830_v25  ;;  %v1190_v46 = vadd.f32 %v2572_v52, %v3773_v24 }
 0x449   :  { %v3811_v21 = vpop.f32.mrf.mxu0 }
 0x453   :  { %v2575_v34 = vpop.f32.mrf.mxu0 }
 0x454   :  { %v1203_v44 = vadd.f32 %v2575_v34, %v3773_v24 }
 0x455   :  { %v1194_v14 = vpop.f32.mrf.mxu0 }
 0x456   :  { %v1195_v31 = vadd.f32 %v3773_v24, %v1194_v14  ;;  %v1182_v14 = vadd.f32 %v3773_v24, %v3811_v21 }
 0x457   :  { %v2576_v53 = vpop.f32.mrf.mxu0 }
 0x458   :  { %v1206_v16 = vadd.f32 %v2576_v53, %v3773_v24 }
 0x459   :  { %v1197_v54 = vpop.f32.mrf.mxu0 }
 0x45a   :  { %v1198_v27 = vadd.f32 %v3773_v24, %v1197_v54 }
 0x463   :  { %v2579_v32 = vpop.f32.mrf.mxu0 }
 0x464   :  { %v1219_v12 = vadd.f32 %v2579_v32, %v3773_v24  ;;  %v1179_v32 = vadd.f32 %v3773_v24, %v3809_v43 }
 0x465   :  { %v1210_v55 = vpop.f32.mrf.mxu0 }
 0x466   :  { %v1211_v42 = vadd.f32 %v3773_v24, %v1210_v55 }
 0x467   :  { %v2580_v56 = vpop.f32.mrf.mxu0 }
 0x468   :  { %v1222_v11 = vadd.f32 %v2580_v56, %v3773_v24 }
 0x469   :  { %v1213_v5 = vpop.f32.mrf.mxu0 }
 0x46a   :  { %v1214_v18 = vadd.f32 %v3773_v24, %v1213_v5 }
 0x473   :  { %v2583_v57 = vpop.f32.mrf.mxu0 }
 0x474   :  { %v1235_v41 = vadd.f32 %v2583_v57, %v3773_v24 }
 0x475   :  { %v1226_v48 = vpop.f32.mrf.mxu0 }
 0x476   :  { %v1227_v58 = vadd.f32 %v3773_v24, %v1226_v48  ;;  %2789 = vtanh.f32 %v1235_v41 }
 0x477   :  { %v2584_v36 = vpop.f32.mrf.mxu0 }
 0x478   :  { %v1238_v59 = vadd.f32 %v2584_v36, %v3773_v24 }
 0x479   :  { %v1229_v60 = vpop.f32.mrf.mxu0 }
 0x47a   :  { %2791 = vtanh.f32 %v1238_v59  ;;  %v1230_v61 = vadd.f32 %v3773_v24, %v1229_v60 }
 0x47b   :  { %2793 = vtanh.f32 %v1227_v58 }
 0x47c   :  { %2795 = vtanh.f32 %v1230_v61 }
 0x47d   :  { %2797 = vtanh.f32 %v1166_v4 }
 0x47e   :  { %2799 = vtanh.f32 %v1222_v11 }
 0x47f   :  { %2801 = vtanh.f32 %v1163_v0  ;;  %v2908_v0 = vld [vmem:[%s4236_s2 + $0x10] ss:$8 sps:$4 sm:$0xff]  }
 0x480   :  { %2803 = vtanh.f32 %v1219_v12  ;;  %v2911_v12 = vld [vmem:[%s4236_s2 + $0x34] ss:$8 sps:$4 sm:$0xff]  }
 0x481   :  { %2805 = vtanh.f32 %v1158_v62  ;;  %v2912_v62 = vld [vmem:[%s4236_s2 + $0x30] ss:$8 sps:$4 sm:$0xff]  }
 0x482   :  { %2807 = vtanh.f32 %v1214_v18  ;;  %v2913_v18 = vld [vmem:[%s4236_s2 + $0x44] ss:$8 sps:$4 sm:$0xff]  }
 0x483   :  { %2809 = vtanh.f32 %v1155_v26  ;;  %v3835_v47 = vpop.eup %2789  ;;  %v2914_v26 = vld [vmem:[%s4236_s2 + $0x40] ss:$8 sps:$4 sm:$0xff]  }
 0x484   :  { %2811 = vtanh.f32 %v1211_v42  ;;  %v2915_v42 = vld [vmem:[%s4236_s2 + $0x54] ss:$8 sps:$4 sm:$0xff]  }
 0x485   :  { %2813 = vtanh.f32 %v1150_v20  ;;  %v2916_v20 = vld [vmem:[%s4236_s2 + $0x50] ss:$8 sps:$4 sm:$0xff]  }
 0x486   :  { %2815 = vtanh.f32 %v1206_v16  ;;  %v2917_v16 = vld [vmem:[%s4236_s2 + $0x64] ss:$8 sps:$4 sm:$0xff]  }
 0x487   :  { %v3838_v3 = vpop.eup %2791  ;;  %2817 = vtanh.f32 %v1147_v17  ;;  %v2918_v17 = vld [vmem:[%s4236_s2 + $0x60] ss:$8 sps:$4 sm:$0xff]  }
 0x488   :  { %v3840_v38 = vpop.eup %2793  ;;  %2819 = vtanh.f32 %v1203_v44  ;;  %v1288_v1 = vpack.c.bf16 %v3838_v3, %v3835_v47  ;;  %v2919_v44 = vld [vmem:[%s4236_s2 + $0x74] ss:$8 sps:$4 sm:$0xff]  }
 0x489   :  { %v3845_v39 = vpop.eup %2795  ;;  %2821 = vtanh.f32 %v1198_v27  ;;  %v2920_v27 = vld [vmem:[%s4236_s2 + $0x70] ss:$8 sps:$4 sm:$0xff]  }
 0x48a   :  { %v3849_v40 = vpop.eup %2797  ;;  %2345 = vmatprep.subr.bf16.mxu1 %v1288_v1  ;;  %v1287_v15 = vpack.c.bf16 %v3845_v39, %v3840_v38  ;;  %2823 = vtanh.f32 %v1195_v31  ;;  %v2921_v31 = vld [vmem:[%s4236_s2 + $0x84] ss:$8 sps:$4 sm:$0xff]   ;;  %v2922_v1 = vld [vmem:[%s4236_s2 + $0x80] ss:$8 sps:$4 sm:$0xff]  }
 0x48b   :  { %v3854_v9 = vpop.eup %2799  ;;  %2346 = vmatpush3.bf16.msra.mxu1 %v1280_v2  ;;  %2825 = vtanh.f32 %v1190_v46  ;;  %v2923_v2 = vld [vmem:[%s4236_s2 + $0x94] ss:$8 sps:$4 sm:$0xff]  }
 0x48c   :  { %v3856_v49 = vpop.eup %2801  ;;  %2347 = vmatprep.subr.bf16.mxu1 %v1287_v15  ;;  %2827 = vtanh.f32 %v1187_v50  ;;  %v2691_v46 = vld [vmem:[%s4242_s8 + $0x18] sm:$0xff]   ;;  %v2692_v15 = vld [vmem:[%s4242_s8 + $0x10] sm:$0xff]  }
 0x48d   :  { %v3860_v51 = vpop.eup %2803  ;;  %v1279_v52 = vpack.c.bf16 %v3849_v40, %v3856_v49  ;;  %2829 = vtanh.f32 %v1182_v14  ;;  %2585 = vmatprep.subr.bf16.mxu0 %v2691_v46  ;;  %v2924_v50 = vld [vmem:[%s4236_s2 + $0x90] ss:$8 sps:$4 sm:$0xff]   ;;  %v2693_v14 = vld [vmem:[%s4242_s8 + $0x8] sm:$0xff]  }
 0x48e   :  { %v3864_v34 = vpop.eup %2805  ;;  %v1286_v53 = vpack.c.bf16 %v3854_v9, %v3860_v51  ;;  %2831 = vtanh.f32 %v1179_v32  ;;  %2586 = vmatpush3.bf16.msra.mxu0 %v2691_v46  ;;  %v2926_v32 = vld [vmem:[%s4236_s2 + $0xa0] ss:$8 sps:$4 sm:$0xff]  }
 0x48f   :  { %v3870_v54 = vpop.eup %2807  ;;  %2348 = vmatpush3.bf16.msra.mxu1 %v1279_v52  ;;  %v2925_v52 = vld [vmem:[%s4236_s2 + $0xa4] ss:$8 sps:$4 sm:$0xff]   ;;  %2587 = vmatprep.subr.bf16.mxu0 %v2692_v15 }
 0x490   :  { %v3872_v45 = vpop.eup %2809  ;;  %2349 = vmatprep.subr.bf16.mxu1 %v1286_v53  ;;  %v2694_v53 = vld [vmem:[%s4242_s8] sm:$0xff]  }
 0x491   :  { %v3876_v55 = vpop.eup %2811  ;;  %v1278_v56 = vpack.c.bf16 %v3864_v34, %v3872_v45 }
 0x492   :  { %v3880_v5 = vpop.eup %2813  ;;  %v1285_v21 = vpack.c.bf16 %v3870_v54, %v3876_v55  ;;  %2588 = vmatpush3.bf16.msra.mxu0 %v2692_v15 }
 0x493   :  { %v3884_v10 = vpop.eup %2815  ;;  %2350 = vmatpush3.bf16.msra.mxu1 %v1278_v56  ;;  %2589 = vmatprep.subr.bf16.mxu0 %v2693_v14  ;;  %v2927_v56 = vld [vmem:[%s4236_s2 + $0xb4] ss:$8 sps:$4 sm:$0xff]  }
 0x494   :  { %v3886_v57 = vpop.eup %2817  ;;  %2351 = vmatprep.subr.bf16.mxu1 %v1285_v21  ;;  %v2928_v21 = vld [vmem:[%s4236_s2 + $0xb0] ss:$8 sps:$4 sm:$0xff]  }
 0x495   :  { %v3888_v24 = vpop.eup %2819  ;;  %v1277_v43 = vpack.c.bf16 %v3880_v5, %v3886_v57 }
 0x496   :  { %v1284_v7 = vpack.c.bf16 %v3884_v10, %v3888_v24  ;;  %v3894_v41 = vpop.eup %2821  ;;  %2590 = vmatpush3.bf16.msra.mxu0 %v2693_v14 }
 0x497   :  { %2352 = vmatpush3.bf16.msra.mxu1 %v1277_v43  ;;  %v3896_v48 = vpop.eup %2823  ;;  %2591 = vmatprep.subr.bf16.mxu0 %v2694_v53  ;;  %v2929_v43 = vld [vmem:[%s4236_s2 + $0xc4] ss:$8 sps:$4 sm:$0xff]  }
 0x498   :  { %2353 = vmatprep.subr.bf16.mxu1 %v1284_v7  ;;  %v1283_v58 = vpack.c.bf16 %v3894_v41, %v3896_v48  ;;  %v3900_v36 = vpop.eup %2825  ;;  %v2930_v7 = vld [vmem:[%s4236_s2 + $0xc0] ss:$8 sps:$4 sm:$0xff]  }
 0x499   :  { %v3905_v59 = vpop.eup %2827 }
 0x49a   :  { %v1282_v4 = vpack.c.bf16 %v3900_v36, %v3905_v59  ;;  %v3909_v60 = vpop.eup %2829  ;;  %2592 = vmatpush3.bf16.msra.mxu0 %v2694_v53 }
 0x49b   :  { %2354 = vmatpush3.bf16.msra.mxu1 %v1276_v22  ;;  %v3914_v11 = vpop.eup %2831  ;;  %v2906_v22 = vld [vmem:[%s4236_s2] ss:$8 sps:$4 sm:$0xff]  }
 0x49c   :  { %2355 = vmatprep.subr.bf16.mxu1 %v1283_v58  ;;  %v1281_v61 = vpack.c.bf16 %v3909_v60, %v3914_v11  ;;  %v2931_v58 = vld [vmem:[%s4236_s2 + $0xd4] ss:$8 sps:$4 sm:$0xff]  }
 0x49f   :  { %2356 = vmatpush3.bf16.msra.mxu1 %v1275_v19  ;;  %v2907_v19 = vld [vmem:[%s4236_s2 + $0x14] ss:$8 sps:$4 sm:$0xff]  }
 0x4a0   :  { %2357 = vmatprep.subr.bf16.mxu1 %v1282_v4  ;;  %v2932_v4 = vld [vmem:[%s4236_s2 + $0xd0] ss:$8 sps:$4 sm:$0xff]  }
 0x4a3   :  { %2358 = vmatpush3.bf16.msra.mxu1 %v1274_v35  ;;  %v2909_v35 = vld [vmem:[%s4236_s2 + $0x24] ss:$8 sps:$4 sm:$0xff]  }
 0x4a4   :  { %2359 = vmatprep.subr.bf16.mxu1 %v1281_v61  ;;  %v2933_v61 = vld [vmem:[%s4236_s2 + $0xe4] ss:$8 sps:$4 sm:$0xff]  }
 0x4a7   :  { %2360 = vmatpush3.bf16.msra.mxu1 %v1273_v33  ;;  %v2910_v33 = vld [vmem:[%s4236_s2 + $0x20] ss:$8 sps:$4 sm:$0xff]  }
 0x4aa   :  { %1357 = vmatmul.mubr.bf16.vlgmr.msra.gmra.mxu1 %v2906_v22  ;;  %v2934_v22 = vld [vmem:[%s4236_s2 + $0xe0] ss:$8 sps:$4 sm:$0xff]  }
 0x4ab   :  { %1364 = vmatprep.mubr.bf16.mxu1 %v2907_v19  ;;  %v2935_v19 = vld [vmem:[%s4236_s2 + $0xf4] ss:$8 sps:$4 sm:$0xff]  }
 0x4b2   :  { %1365 = vmatmul.mubr.bf16.gmra.mxu1 %v2908_v0  ;;  %v2936_v0 = vld [vmem:[%s4236_s2 + $0xf0] ss:$8 sps:$4 sm:$0xff]  }
 0x4b3   :  { %1372 = vmatprep.mubr.bf16.mxu1 %v2909_v35 }
 0x4ba   :  { %1373 = vmatmul.mubr.bf16.gmra.mxu1 %v2910_v33 }
 0x4bb   :  { %1380 = vmatprep.mubr.bf16.mxu1 %v2911_v12 }
 0x4c2   :  { %1381 = vmatmul.mubr.bf16.gmra.mxu1 %v2912_v62 }
 0x4c3   :  { %1388 = vmatprep.mubr.bf16.mxu1 %v2913_v18  ;;  %v4029_v18 = vstv %s1290_s30 }
 0x4ca   :  { %1389 = vmatmul.mubr.bf16.gmra.mxu1 %v2914_v26 }
 0x4cb   :  { %1396 = vmatprep.mubr.bf16.mxu1 %v2915_v42  ;;  %v1292_v42 = vmul.f32 %v3785_v6, %v4029_v18  ;;  %v1295_v6 = vmul.f32 %v3782_v30, %v4029_v18 }
 0x4d2   :  { %1397 = vmatmul.mubr.bf16.gmra.mxu1 %v2916_v20  ;;  %v1293_v20 = vmul.f32 %v3790_v29, %v4029_v18 }
 0x4d3   :  { %1404 = vmatprep.mubr.bf16.mxu1 %v2917_v16 }
 0x4da   :  { %1405 = vmatmul.mubr.bf16.gmra.mxu1 %v2918_v17 }
 0x4db   :  { %1412 = vmatprep.mubr.bf16.mxu1 %v2919_v44 }
 0x4e2   :  { %1413 = vmatmul.mubr.bf16.gmra.mxu1 %v2920_v27 }
 0x4e3   :  { %1420 = vmatprep.mubr.bf16.mxu1 %v2921_v31 }
 0x4ea   :  { %1421 = vmatmul.mubr.bf16.gmra.mxu1 %v2922_v1 }
 0x4eb   :  { %1428 = vmatprep.mubr.bf16.mxu1 %v2923_v2 }
 0x4f2   :  { %1429 = vmatmul.mubr.bf16.gmra.mxu1 %v2924_v50  ;;  %v1294_v50 = vmul.f32 %v3780_v23, %v4029_v18  ;;  %v1297_v23 = vmul.f32 %v3803_v37, %v4029_v18 }
 0x4f3   :  { %1436 = vmatprep.mubr.bf16.mxu1 %v2925_v52 }
 0x4fa   :  { %1437 = vmatmul.mubr.bf16.gmra.mxu1 %v2926_v32 }
 0x4fb   :  { %1444 = vmatprep.mubr.bf16.mxu1 %v2927_v56 }
 0x502   :  { %1445 = vmatmul.mubr.bf16.gmra.mxu1 %v2928_v21 }
 0x503   :  { %1452 = vmatprep.mubr.bf16.mxu1 %v2929_v43 }
 0x50a   :  { %1453 = vmatmul.mubr.bf16.gmra.mxu1 %v2930_v7 }
 0x50b   :  { %1460 = vmatprep.mubr.bf16.mxu1 %v2931_v58  ;;  %v1296_v58 = vmul.f32 %v3799_v28, %v4029_v18  ;;  %v1299_v28 = vmul.f32 %v3797_v63, %v4029_v18 }
 0x512   :  { %1461 = vmatmul.mubr.bf16.gmra.mxu1 %v2932_v4 }
 0x513   :  { %1468 = vmatprep.mubr.bf16.mxu1 %v2933_v61 }
 0x51a   :  { %1469 = vmatmul.mubr.bf16.gmra.mxu1 %v2934_v22 }
 0x51b   :  { %1476 = vmatprep.mubr.bf16.mxu1 %v2935_v19 }
 0x522   :  { %1477 = vmatmul.mubr.bf16.gmra.mxu1 %v2936_v0 }
 0x56a   :  { %v2361_v35 = vpop.f32.mrf.mxu1 }
 0x56c   :  { %v2362_v33 = vpop.f32.mrf.mxu1 }
 0x56d   :  { %v2363_v62 = vadd.f32 %v2362_v33, %v2361_v35 }
 0x56e   :  { %v2364_v12 = vpop.f32.mrf.mxu1 }
 0x56f   :  { %v1359_v44 = vadd.f32 %v2363_v62, %v1292_v42  ;;  %v1298_v62 = vmul.f32 %v3795_v13, %v4029_v18  ;;  %v1301_v13 = vmul.f32 %v3880_v5, %v4029_v18 }
 0x570   :  { %v2365_v26 = vpop.f32.mrf.mxu1 }
 0x571   :  { %v2366_v16 = vadd.f32 %v2365_v26, %v2364_v12 }
 0x572   :  { %v2367_v17 = vpop.f32.mrf.mxu1 }
 0x573   :  { %v1362_v27 = vadd.f32 %v2366_v16, %v1293_v20 }
 0x574   :  { %v2368_v31 = vpop.f32.mrf.mxu1 }
 0x575   :  { %v1485_v1 = vpack.c.bf16 %v1362_v27, %v1359_v44  ;;  %v2369_v46 = vadd.f32 %v2368_v31, %v2367_v17 }
 0x576   :  { %v2370_v2 = vpop.f32.mrf.mxu1 }
 0x577   :  { %2593 = vmatprep.mubr.msk.bf16.mxu0 %vm1031_vm1, %v1485_v1  ;;  %v1367_v29 = vadd.f32 %v2369_v46, %v1294_v50  ;;  %v1300_v1 = vmul.f32 %v3886_v57, %v4029_v18  ;;  %v1303_v57 = vmul.f32 %v3864_v34, %v4029_v18 }
 0x578   :  { %v2371_v15 = vpop.f32.mrf.mxu1 }
 0x579   :  { %v2372_v52 = vadd.f32 %v2371_v15, %v2370_v2 }
 0x57a   :  { %v2373_v14 = vpop.f32.mrf.mxu1 }
 0x57b   :  { %v1370_v53 = vadd.f32 %v2372_v52, %v1295_v6 }
 0x57c   :  { %v2374_v32 = vpop.f32.mrf.mxu1 }
 0x57d   :  { %v1486_v56 = vpack.c.bf16 %v1370_v53, %v1367_v29  ;;  %v2375_v43 = vadd.f32 %v2374_v32, %v2373_v14  ;;  %v1302_v53 = vmul.f32 %v3872_v45, %v4029_v18  ;;  %v1305_v45 = vmul.f32 %v3849_v40, %v4029_v18 }
 0x57e   :  { %v2376_v21 = vpop.f32.mrf.mxu1 }
 0x57f   :  { %2594 = vmatmul.mubr.msk.bf16.vlgmr.msra.gmra.mxu0 %vm1031_vm1, %v1486_v56  ;;  %v1375_v30 = vadd.f32 %v2375_v43, %v1296_v58 }
 0x580   :  { %v2377_v7 = vpop.f32.mrf.mxu1 }
 0x581   :  { %v2378_v4 = vadd.f32 %v2377_v7, %v2376_v21 }
 0x582   :  { %v2379_v61 = vpop.f32.mrf.mxu1 }
 0x583   :  { %v1378_v22 = vadd.f32 %v2378_v4, %v1297_v23 }
 0x584   :  { %v2380_v19 = vpop.f32.mrf.mxu1 }
 0x585   :  { %v1487_v0 = vpack.c.bf16 %v1378_v22, %v1375_v30  ;;  %v2381_v33 = vadd.f32 %v2380_v19, %v2379_v61  ;;  %v1304_v61 = vmul.f32 %v3856_v49, %v4029_v18  ;;  %v1307_v49 = vmul.f32 %v3833_v8, %v4029_v18 }
 0x586   :  { %v2382_v35 = vpop.f32.mrf.mxu1 }
 0x587   :  { %2597 = vmatprep.mubr.msk.bf16.mxu0 %vm1031_vm1, %v1487_v0  ;;  %v1383_v37 = vadd.f32 %v2381_v33, %v1298_v62 }
 0x588   :  { %v2383_v12 = vpop.f32.mrf.mxu1 }
 0x589   :  { %v2384_v26 = vadd.f32 %v2383_v12, %v2382_v35 }
 0x58a   :  { %v2385_v42 = vpop.f32.mrf.mxu1 }
 0x58b   :  { %v1386_v20 = vadd.f32 %v2384_v26, %v1299_v28  ;;  %v1306_v28 = vmul.f32 %v3830_v25, %v4029_v18  ;;  %v1309_v25 = vmul.f32 %v3909_v60, %v4029_v18 }
 0x58c   :  { %v2386_v16 = vpop.f32.mrf.mxu1 }
 0x58d   :  { %v1488_v17 = vpack.c.bf16 %v1386_v20, %v1383_v37  ;;  %v2387_v27 = vadd.f32 %v2386_v16, %v2385_v42 }
 0x58e   :  { %v2388_v44 = vpop.f32.mrf.mxu1 }
 0x58f   :  { %2598 = vmatmul.mubr.msk.bf16.gmra.mxu0 %vm1031_vm1, %v1488_v17  ;;  %v1391_v63 = vadd.f32 %v2387_v27, %v1300_v1 }
 0x590   :  { %v2389_v31 = vpop.f32.mrf.mxu1 }
 0x591   :  { %v2390_v2 = vadd.f32 %v2389_v31, %v2388_v44  ;;  %v1308_v31 = vmul.f32 %v3914_v11, %v4029_v18  ;;  %v1311_v11 = vmul.f32 %v3900_v36, %v4029_v18 }
 0x592   :  { %v2391_v46 = vpop.f32.mrf.mxu1 }
 0x593   :  { %v1394_v15 = vadd.f32 %v2390_v2, %v1301_v13 }
 0x594   :  { %v2392_v50 = vpop.f32.mrf.mxu1 }
 0x595   :  { %v1489_v6 = vpack.c.bf16 %v1394_v15, %v1391_v63  ;;  %v2393_v14 = vadd.f32 %v2392_v50, %v2391_v46 }
 0x596   :  { %v2394_v52 = vpop.f32.mrf.mxu1 }
 0x597   :  { %2601 = vmatprep.mubr.msk.bf16.mxu0 %vm1031_vm1, %v1489_v6  ;;  %v1399_v5 = vadd.f32 %v2393_v14, %v1302_v53 }
 0x598   :  { %v2395_v29 = vpop.f32.mrf.mxu1 }
 0x599   :  { %v2396_v32 = vadd.f32 %v2395_v29, %v2394_v52  ;;  %v1310_v52 = vmul.f32 %v3905_v59, %v4029_v18  ;;  %v1313_v59 = vmul.f32 %v3894_v41, %v4029_v18 }
 0x59a   :  { %v2397_v56 = vpop.f32.mrf.mxu1 }
 0x59b   :  { %v1402_v21 = vadd.f32 %v2396_v32, %v1303_v57 }
 0x59c   :  { %v2398_v43 = vpop.f32.mrf.mxu1 }
 0x59d   :  { %v1490_v7 = vpack.c.bf16 %v1402_v21, %v1399_v5  ;;  %v2399_v23 = vadd.f32 %v2398_v43, %v2397_v56  ;;  %v1312_v43 = vmul.f32 %v3896_v48, %v4029_v18  ;;  %v1315_v48 = vmul.f32 %v3884_v10, %v4029_v18 }
 0x59e   :  { %v2400_v58 = vpop.f32.mrf.mxu1 }
 0x59f   :  { %2602 = vmatmul.mubr.msk.bf16.gmra.mxu0 %vm1031_vm1, %v1490_v7  ;;  %v1407_v34 = vadd.f32 %v2399_v23, %v1304_v61 }
 0x5a0   :  { %v2401_v4 = vpop.f32.mrf.mxu1 }
 0x5a1   :  { %v2402_v30 = vadd.f32 %v2401_v4, %v2400_v58 }
 0x5a2   :  { %v2403_v22 = vpop.f32.mrf.mxu1 }
 0x5a3   :  { %v1410_v19 = vadd.f32 %v2402_v30, %v1305_v45 }
 0x5a4   :  { %v2404_v0 = vpop.f32.mrf.mxu1 }
 0x5a5   :  { %v1491_v35 = vpack.c.bf16 %v1410_v19, %v1407_v34  ;;  %v2405_v12 = vadd.f32 %v2404_v0, %v2403_v22  ;;  %v1314_v34 = vmul.f32 %v3888_v24, %v4029_v18  ;;  %v1317_v24 = vmul.f32 %v3870_v54, %v4029_v18 }
 0x5a6   :  { %v2406_v33 = vpop.f32.mrf.mxu1 }
 0x5a7   :  { %2605 = vmatprep.mubr.msk.bf16.mxu0 %vm1031_vm1, %v1491_v35  ;;  %v1415_v40 = vadd.f32 %v2405_v12, %v1306_v28 }
 0x5a8   :  { %v2407_v62 = vpop.f32.mrf.mxu1 }
 0x5a9   :  { %v2408_v26 = vadd.f32 %v2407_v62, %v2406_v33 }
 0x5aa   :  { %v2409_v42 = vpop.f32.mrf.mxu1 }
 0x5ab   :  { %v1418_v37 = vadd.f32 %v2408_v26, %v1307_v49  ;;  %v1316_v26 = vmul.f32 %v3876_v55, %v4029_v18  ;;  %v1319_v55 = vmul.f32 %v3854_v9, %v4029_v18 }
 0x5ac   :  { %v2410_v20 = vpop.f32.mrf.mxu1 }
 0x5ad   :  { %v1492_v16 = vpack.c.bf16 %v1418_v37, %v1415_v40  ;;  %v2411_v44 = vadd.f32 %v2410_v20, %v2409_v42 }
 0x5ae   :  { %v2412_v17 = vpop.f32.mrf.mxu1 }
 0x5af   :  { %2606 = vmatmul.mubr.msk.bf16.gmra.mxu0 %vm1031_vm1, %v1492_v16  ;;  %v1423_v8 = vadd.f32 %v2411_v44, %v1308_v31  ;;  %v1318_v31 = vmul.f32 %v3860_v51, %v4029_v18  ;;  %v1321_v51 = vmul.f32 %v3845_v39, %v4029_v18 }
 0x5b0   :  { %v2413_v27 = vpop.f32.mrf.mxu1 }
 0x5b1   :  { %v2414_v1 = vadd.f32 %v2413_v27, %v2412_v17 }
 0x5b2   :  { %v2415_v13 = vpop.f32.mrf.mxu1 }
 0x5b3   :  { %v1426_v2 = vadd.f32 %v2414_v1, %v1309_v25 }
 0x5b4   :  { %v2416_v46 = vpop.f32.mrf.mxu1 }
 0x5b5   :  { %v1493_v63 = vpack.c.bf16 %v1426_v2, %v1423_v8  ;;  %v2417_v50 = vadd.f32 %v2416_v46, %v2415_v13 }
 0x5b6   :  { %v2418_v15 = vpop.f32.mrf.mxu1 }
 0x5b7   :  { %2609 = vmatprep.mubr.msk.bf16.mxu0 %vm1031_vm1, %v1493_v63  ;;  %v1431_v60 = vadd.f32 %v2417_v50, %v1310_v52  ;;  %v1320_v50 = vmul.f32 %v3840_v38, %v4029_v18  ;;  %v1323_v38 = vmul.f32 %v3838_v3, %v4029_v18 }
 0x5b8   :  { %v2419_v6 = vpop.f32.mrf.mxu1 }
 0x5b9   :  { %v2420_v14 = vadd.f32 %v2419_v6, %v2418_v15 }
 0x5ba   :  { %v2421_v29 = vpop.f32.mrf.mxu1 }
 0x5bb   :  { %v1434_v53 = vadd.f32 %v2420_v14, %v1311_v11 }
 0x5bc   :  { %v2422_v57 = vpop.f32.mrf.mxu1 }
 0x5bd   :  { %v1494_v32 = vpack.c.bf16 %v1434_v53, %v1431_v60  ;;  %v2423_v5 = vadd.f32 %v2422_v57, %v2421_v29 }
 0x5be   :  { %v2424_v56 = vpop.f32.mrf.mxu1 }
 0x5bf   :  { %2610 = vmatmul.mubr.msk.bf16.gmra.mxu0 %vm1031_vm1, %v1494_v32  ;;  %v1439_v36 = vadd.f32 %v2423_v5, %v1312_v43  ;;  %v1322_v32 = vmul.f32 %v3835_v47, %v4029_v18  ;;  %v4114_v43 = vld [vmem:[%s4243_s9] ss:$0 sm:$0xff] }
 0x5c0   :  { %v2425_v21 = vpop.f32.mrf.mxu1 }
 0x5c1   :  { %v2426_v7 = vadd.f32 %v2425_v21, %v2424_v56 }
 0x5c2   :  { %v2427_v58 = vpop.f32.mrf.mxu1 }
 0x5c3   :  { %v1442_v23 = vadd.f32 %v2426_v7, %v1313_v59 }
 0x5c4   :  { %v2428_v4 = vpop.f32.mrf.mxu1 }
 0x5c5   :  { %v1495_v61 = vpack.c.bf16 %v1442_v23, %v1439_v36  ;;  %v2429_v30 = vadd.f32 %v2428_v4, %v2427_v58 }
 0x5c6   :  { %v2430_v45 = vpop.f32.mrf.mxu1 }
 0x5c7   :  { %2613 = vmatprep.mubr.msk.bf16.mxu0 %vm1031_vm1, %v1495_v61  ;;  %v1447_v41 = vadd.f32 %v2429_v30, %v1314_v34 }
 0x5c8   :  { %v2431_v22 = vpop.f32.mrf.mxu1 }
 0x5c9   :  { %v2432_v19 = vadd.f32 %v2431_v22, %v2430_v45 }
 0x5ca   :  { %v2433_v0 = vpop.f32.mrf.mxu1 }
 0x5cb   :  { %v1450_v35 = vadd.f32 %v2432_v19, %v1315_v48 }
 0x5cc   :  { %v2434_v33 = vpop.f32.mrf.mxu1 }
 0x5cd   :  { %v1496_v12 = vpack.c.bf16 %v1450_v35, %v1447_v41  ;;  %v2435_v28 = vadd.f32 %v2434_v33, %v2433_v0 }
 0x5ce   :  { %v2436_v62 = vpop.f32.mrf.mxu1 }
 0x5cf   :  { %2614 = vmatmul.mubr.msk.bf16.gmra.mxu0 %vm1031_vm1, %v1496_v12  ;;  %v1455_v10 = vadd.f32 %v2435_v28, %v1316_v26  ;;  %v2697_v26 = vld [vmem:[%s4237_s3 + $0x4] ss:$8 sps:$4 sm:$0xff]  }
 0x5d0   :  { %v2437_v49 = vpop.f32.mrf.mxu1 }
 0x5d1   :  { %v2438_v42 = vadd.f32 %v2437_v49, %v2436_v62 }
 0x5d2   :  { %v2439_v40 = vpop.f32.mrf.mxu1 }
 0x5d3   :  { %v1458_v37 = vadd.f32 %v2438_v42, %v1317_v24 }
 0x5d4   :  { %v2440_v20 = vpop.f32.mrf.mxu1 }
 0x5d5   :  { %v1497_v16 = vpack.c.bf16 %v1458_v37, %v1455_v10  ;;  %v2441_v44 = vadd.f32 %v2440_v20, %v2439_v40 }
 0x5d6   :  { %v2442_v17 = vpop.f32.mrf.mxu1 }
 0x5d7   :  { %2617 = vmatprep.mubr.msk.bf16.mxu0 %vm1031_vm1, %v1497_v16  ;;  %v1463_v54 = vadd.f32 %v2441_v44, %v1318_v31 }
 0x5d8   :  { %v2443_v27 = vpop.f32.mrf.mxu1 }
 0x5d9   :  { %v2444_v25 = vadd.f32 %v2443_v27, %v2442_v17 }
 0x5da   :  { %v2445_v1 = vpop.f32.mrf.mxu1 }
 0x5db   :  { %v1466_v13 = vadd.f32 %v2444_v25, %v1319_v55 }
 0x5dc   :  { %v2446_v8 = vpop.f32.mrf.mxu1 }
 0x5dd   :  { %v1498_v2 = vpack.c.bf16 %v1466_v13, %v1463_v54  ;;  %v2447_v63 = vadd.f32 %v2446_v8, %v2445_v1 }
 0x5de   :  { %v2448_v46 = vpop.f32.mrf.mxu1 }
 0x5df   :  { %2618 = vmatmul.mubr.msk.bf16.gmra.mxu0 %vm1031_vm1, %v1498_v2  ;;  %v1471_v9 = vadd.f32 %v2447_v63, %v1320_v50 }
 0x5e0   :  { %v2449_v15 = vpop.f32.mrf.mxu1 }
 0x5e1   :  { %v2450_v6 = vadd.f32 %v2449_v15, %v2448_v46 }
 0x5e2   :  { %v2451_v52 = vpop.f32.mrf.mxu1 }
 0x5e3   :  { %v1474_v11 = vadd.f32 %v2450_v6, %v1321_v51 }
 0x5e4   :  { %v2452_v14 = vpop.f32.mrf.mxu1 }
 0x5e5   :  { %v1499_v29 = vpack.c.bf16 %v1474_v11, %v1471_v9  ;;  %v2453_v53 = vadd.f32 %v2452_v14, %v2451_v52 }
 0x5e6   :  { %v2454_v60 = vpop.f32.mrf.mxu1 }
 0x5e7   :  { %2621 = vmatprep.mubr.msk.bf16.mxu0 %vm1031_vm1, %v1499_v29  ;;  %v1479_v5 = vadd.f32 %v2453_v53, %v1322_v32 }
 0x5e8   :  { %v2455_v57 = vpop.f32.mrf.mxu1 }
 0x5e9   :  { %v2456_v56 = vadd.f32 %v2455_v57, %v2454_v60 }
 0x5eb   :  { %v1482_v39 = vadd.f32 %v2456_v56, %v1323_v38 }
 0x5ed   :  { %v1500_v21 = vpack.c.bf16 %v1482_v39, %v1479_v5 }
 0x5ef   :  { %2622 = vmatmul.mubr.msk.bf16.gmra.mxu0 %vm1031_vm1, %v1500_v21 }
 0x5f0   :  { %1853 = vmatprep.mubr.bf16.mxu0 %v2697_v26 }
 0x63f   :  { %v2595_v59 = vpop.f32.mrf.mxu0 }
 0x640   :  { %v1631_v7 = vadd.f32 %v2595_v59, %v4114_v43 }
 0x641   :  { %v1622_v58 = vpop.f32.mrf.mxu0 }
 0x642   :  { %v1623_v47 = vadd.f32 %v4114_v43, %v1622_v58  ;;  %2833 = vtanh.f32 %v1631_v7 }
 0x643   :  { %v2596_v36 = vpop.f32.mrf.mxu0 }
 0x644   :  { %v1634_v3 = vadd.f32 %v2596_v36, %v4114_v43 }
 0x645   :  { %v1625_v18 = vpop.f32.mrf.mxu0 }
 0x646   :  { %2835 = vtanh.f32 %v1634_v3  ;;  %v1626_v23 = vadd.f32 %v4114_v43, %v1625_v18 }
 0x647   :  { %2837 = vtanh.f32 %v1623_v47 }
 0x648   :  { %2839 = vtanh.f32 %v1626_v23 }
 0x64f   :  { %v2599_v4 = vpop.f32.mrf.mxu0  ;;  %v4121_v30 = vpop.eup %2833 }
 0x650   :  { %v1647_v61 = vadd.f32 %v2599_v4, %v4114_v43 }
 0x651   :  { %v1638_v45 = vpop.f32.mrf.mxu0 }
 0x652   :  { %v1639_v34 = vadd.f32 %v4114_v43, %v1638_v45  ;;  %2841 = vtanh.f32 %v1647_v61 }
 0x653   :  { %v4123_v22 = vpop.eup %2835  ;;  %v2600_v48 = vpop.f32.mrf.mxu0 }
 0x654   :  { %v4126_v19 = vpop.eup %2837  ;;  %v1650_v0 = vadd.f32 %v2600_v48, %v4114_v43  ;;  %v1782_v41 = vpack.c.bf16 %v4123_v22, %v4121_v30  ;;  %v2698_v30 = vld [vmem:[%s4237_s3 + $0x10] ss:$8 sps:$4 sm:$0xff]  }
 0x655   :  { %v4131_v35 = vpop.eup %2839  ;;  %v1641_v33 = vpop.f32.mrf.mxu0  ;;  %v2701_v22 = vld [vmem:[%s4244_s10 + $0x18] sm:$0xff]  }
 0x656   :  { %2843 = vtanh.f32 %v1650_v0  ;;  %v1642_v12 = vadd.f32 %v4114_v43, %v1641_v33  ;;  %v1781_v62 = vpack.c.bf16 %v4131_v35, %v4126_v19  ;;  %v2702_v19 = vld [vmem:[%s4244_s10 + $0x10] sm:$0xff]   ;;  %v2704_v35 = vld [vmem:[%s4244_s10] sm:$0xff]  }
 0x657   :  { %2845 = vtanh.f32 %v1639_v34 }
 0x658   :  { %2847 = vtanh.f32 %v1642_v12 }
 0x65f   :  { %v4136_v28 = vpop.eup %2841  ;;  %v2603_v37 = vpop.f32.mrf.mxu0 }
 0x660   :  { %v1663_v58 = vadd.f32 %v2603_v37, %v4114_v43 }
 0x661   :  { %v1654_v20 = vpop.f32.mrf.mxu0 }
 0x662   :  { %v1655_v18 = vadd.f32 %v4114_v43, %v1654_v20 }
 0x663   :  { %v4138_v49 = vpop.eup %2843  ;;  %v2604_v16 = vpop.f32.mrf.mxu0 }
 0x664   :  { %v4143_v24 = vpop.eup %2845  ;;  %v1784_v42 = vpack.c.bf16 %v4138_v49, %v4136_v28  ;;  %v1666_v59 = vadd.f32 %v2604_v16, %v4114_v43  ;;  %v2695_v28 = vld [vmem:[%s4237_s3] ss:$8 sps:$4 sm:$0xff]   ;;  %v2700_v49 = vld [vmem:[%s4237_s3 + $0x14] ss:$8 sps:$4 sm:$0xff]  }
 0x665   :  { %v4147_v40 = vpop.eup %2847  ;;  %v1657_v17 = vpop.f32.mrf.mxu0 }
 0x666   :  { %v1783_v10 = vpack.c.bf16 %v4147_v40, %v4143_v24  ;;  %v1658_v36 = vadd.f32 %v4114_v43, %v1657_v17 }
 0x66f   :  { %v2607_v44 = vpop.f32.mrf.mxu0 }
 0x670   :  { %v1679_v52 = vadd.f32 %v2607_v44, %v4114_v43 }
 0x671   :  { %v1670_v27 = vpop.f32.mrf.mxu0 }
 0x672   :  { %2849 = vtanh.f32 %v1679_v52  ;;  %v1671_v39 = vadd.f32 %v4114_v43, %v1670_v27 }
 0x673   :  { %v2608_v31 = vpop.f32.mrf.mxu0 }
 0x674   :  { %v1682_v11 = vadd.f32 %v2608_v31, %v4114_v43 }
 0x675   :  { %v1673_v55 = vpop.f32.mrf.mxu0 }
 0x676   :  { %2851 = vtanh.f32 %v1682_v11  ;;  %v1674_v32 = vadd.f32 %v4114_v43, %v1673_v55 }
 0x67f   :  { %v4151_v25 = vpop.f32.mrf.mxu0  ;;  %v2850_v23 = vpop.eup %2849 }
 0x680   :  { %v1695_v31 = vadd.f32 %v4151_v25, %v4114_v43 }
 0x681   :  { %v4153_v1 = vpop.f32.mrf.mxu0 }
 0x683   :  { %v2612_v54 = vpop.f32.mrf.mxu0  ;;  %v2852_v61 = vpop.eup %2851 }
 0x684   :  { %v1788_v37 = vpack.c.bf16 %v2852_v61, %v2850_v23  ;;  %v1698_v16 = vadd.f32 %v2612_v54, %v4114_v43  ;;  %v2077_v23 = vld [vmem:[%s4245_s11] ss:$0 sm:$0xff] }
 0x685   :  { %v4155_v13 = vpop.f32.mrf.mxu0 }
 0x68f   :  { %v2615_v8 = vpop.f32.mrf.mxu0 }
 0x690   :  { %v1711_v4 = vadd.f32 %v2615_v8, %v4114_v43 }
 0x691   :  { %v1702_v2 = vpop.f32.mrf.mxu0 }
 0x692   :  { %v1703_v33 = vadd.f32 %v4114_v43, %v1702_v2 }
 0x693   :  { %v2616_v46 = vpop.f32.mrf.mxu0 }
 0x694   :  { %v1714_v3 = vadd.f32 %v2616_v46, %v4114_v43  ;;  %v1690_v46 = vadd.f32 %v4114_v43, %v4155_v13 }
 0x695   :  { %v1705_v63 = vpop.f32.mrf.mxu0 }
 0x696   :  { %v1706_v34 = vadd.f32 %v4114_v43, %v1705_v63 }
 0x69f   :  { %v2619_v15 = vpop.f32.mrf.mxu0 }
 0x6a0   :  { %v1727_v21 = vadd.f32 %v2619_v15, %v4114_v43 }
 0x6a1   :  { %v1718_v50 = vpop.f32.mrf.mxu0 }
 0x6a2   :  { %v1719_v47 = vadd.f32 %v4114_v43, %v1718_v50  ;;  %v1687_v50 = vadd.f32 %v4114_v43, %v4153_v1 }
 0x6a3   :  { %v2620_v51 = vpop.f32.mrf.mxu0 }
 0x6a4   :  { %v1730_v56 = vadd.f32 %v2620_v51, %v4114_v43 }
 0x6a5   :  { %v1721_v6 = vpop.f32.mrf.mxu0 }
 0x6a6   :  { %v1722_v7 = vadd.f32 %v4114_v43, %v1721_v6 }
 0x6af   :  { %v2623_v9 = vpop.f32.mrf.mxu0 }
 0x6b0   :  { %v1743_v14 = vadd.f32 %v2623_v9, %v4114_v43 }
 0x6b1   :  { %v1734_v29 = vpop.f32.mrf.mxu0 }
 0x6b2   :  { %v1735_v60 = vadd.f32 %v4114_v43, %v1734_v29  ;;  %2853 = vtanh.f32 %v1743_v14 }
 0x6b3   :  { %v2624_v53 = vpop.f32.mrf.mxu0 }
 0x6b4   :  { %v1746_v57 = vadd.f32 %v2624_v53, %v4114_v43 }
 0x6b5   :  { %v1737_v38 = vpop.f32.mrf.mxu0 }
 0x6b6   :  { %2855 = vtanh.f32 %v1746_v57  ;;  %v1738_v5 = vadd.f32 %v4114_v43, %v1737_v38 }
 0x6b7   :  { %2857 = vtanh.f32 %v1735_v60 }
 0x6b8   :  { %2859 = vtanh.f32 %v1738_v5 }
 0x6b9   :  { %2861 = vtanh.f32 %v1674_v32 }
 0x6ba   :  { %2863 = vtanh.f32 %v1730_v56 }
 0x6bb   :  { %2865 = vtanh.f32 %v1671_v39 }
 0x6bc   :  { %2867 = vtanh.f32 %v1727_v21 }
 0x6bd   :  { %2869 = vtanh.f32 %v1666_v59 }
 0x6be   :  { %2871 = vtanh.f32 %v1722_v7 }
 0x6bf   :  { %2873 = vtanh.f32 %v1663_v58  ;;  %v2854_v45 = vpop.eup %2853 }
 0x6c0   :  { %2875 = vtanh.f32 %v1719_v47 }
 0x6c1   :  { %2877 = vtanh.f32 %v1658_v36 }
 0x6c2   :  { %2879 = vtanh.f32 %v1714_v3 }
 0x6c3   :  { %v2856_v48 = vpop.eup %2855  ;;  %2881 = vtanh.f32 %v1655_v18 }
 0x6c4   :  { %v2858_v0 = vpop.eup %2857  ;;  %2883 = vtanh.f32 %v1711_v4  ;;  %v1796_v12 = vpack.c.bf16 %v2856_v48, %v2854_v45 }
 0x6c5   :  { %v2860_v26 = vpop.eup %2859  ;;  %2885 = vtanh.f32 %v1706_v34 }
 0x6c6   :  { %v2862_v20 = vpop.eup %2861  ;;  %2477 = vmatprep.subr.bf16.mxu0 %v1796_v12  ;;  %v1795_v17 = vpack.c.bf16 %v2860_v26, %v2858_v0  ;;  %2887 = vtanh.f32 %v1703_v33 }
 0x6c7   :  { %v2864_v44 = vpop.eup %2863  ;;  %2478 = vmatpush3.bf16.msra.mxu0 %v1788_v37  ;;  %2889 = vtanh.f32 %v1698_v16 }
 0x6c8   :  { %v2866_v27 = vpop.eup %2865  ;;  %2479 = vmatprep.subr.bf16.mxu0 %v1795_v17  ;;  %2891 = vtanh.f32 %v1695_v31 }
 0x6c9   :  { %v2868_v55 = vpop.eup %2867  ;;  %v1787_v8 = vpack.c.bf16 %v2862_v20, %v2866_v27  ;;  %2893 = vtanh.f32 %v1690_v46 }
 0x6ca   :  { %v2870_v2 = vpop.eup %2869  ;;  %v1794_v63 = vpack.c.bf16 %v2864_v44, %v2868_v55  ;;  %2895 = vtanh.f32 %v1687_v50 }
 0x6cb   :  { %v2872_v54 = vpop.eup %2871  ;;  %2480 = vmatpush3.bf16.msra.mxu0 %v1787_v8 }
 0x6cc   :  { %v2874_v15 = vpop.eup %2873  ;;  %2481 = vmatprep.subr.bf16.mxu0 %v1794_v63 }
 0x6cd   :  { %v2876_v51 = vpop.eup %2875  ;;  %v1786_v25 = vpack.c.bf16 %v2870_v2, %v2874_v15 }
 0x6ce   :  { %v2878_v6 = vpop.eup %2877  ;;  %v1793_v52 = vpack.c.bf16 %v2872_v54, %v2876_v51 }
 0x6cf   :  { %v2880_v9 = vpop.eup %2879  ;;  %2482 = vmatpush3.bf16.msra.mxu0 %v1786_v25 }
 0x6d0   :  { %v2882_v11 = vpop.eup %2881  ;;  %2483 = vmatprep.subr.bf16.mxu0 %v1793_v52 }
 0x6d1   :  { %v2884_v13 = vpop.eup %2883  ;;  %v1785_v14 = vpack.c.bf16 %v2878_v6, %v2882_v11 }
 0x6d2   :  { %v1792_v29 = vpack.c.bf16 %v2880_v9, %v2884_v13  ;;  %v2886_v60 = vpop.eup %2885 }
 0x6d3   :  { %2484 = vmatpush3.bf16.msra.mxu0 %v1785_v14  ;;  %v2888_v53 = vpop.eup %2887 }
 0x6d4   :  { %2485 = vmatprep.subr.bf16.mxu0 %v1792_v29  ;;  %v1791_v57 = vpack.c.bf16 %v2886_v60, %v2888_v53  ;;  %v2890_v43 = vpop.eup %2889 }
 0x6d5   :  { %v2892_v1 = vpop.eup %2891 }
 0x6d6   :  { %v1790_v32 = vpack.c.bf16 %v2890_v43, %v2892_v1  ;;  %v2894_v38 = vpop.eup %2893 }
 0x6d7   :  { %2486 = vmatpush3.bf16.msra.mxu0 %v1784_v42  ;;  %v2896_v56 = vpop.eup %2895 }
 0x6d8   :  { %2487 = vmatprep.subr.bf16.mxu0 %v1791_v57  ;;  %v1789_v5 = vpack.c.bf16 %v2894_v38, %v2896_v56 }
 0x6db   :  { %2488 = vmatpush3.bf16.msra.mxu0 %v1783_v10 }
 0x6dc   :  { %2489 = vmatprep.subr.bf16.mxu0 %v1790_v32 }
 0x6df   :  { %2490 = vmatpush3.bf16.msra.mxu0 %v1782_v41  ;;  %v2703_v41 = vld [vmem:[%s4244_s10 + $0x8] sm:$0xff]  }
 0x6e0   :  { %2491 = vmatprep.subr.bf16.mxu0 %v1789_v5 }
 0x6e3   :  { %2492 = vmatpush3.bf16.msra.mxu0 %v1781_v62 }
 0x6e4   :  { %2625 = vmatprep.subr.bf16.mxu0 %v2701_v22 }
 0x6e6   :  { %1854 = vmatmul.mubr.bf16.vlgmr.msra.gmra.mxu0 %v2695_v28 }
 0x6e7   :  { %1861 = vmatprep.mubr.bf16.mxu0 %v2700_v49  ;;  %2626 = vmatpush3.bf16.msra.mxu0 %v2701_v22 }
 0x6e8   :  { %2627 = vmatprep.subr.bf16.mxu0 %v2702_v19 }
 0x6eb   :  { %2628 = vmatpush3.bf16.msra.mxu0 %v2702_v19 }
 0x6ec   :  { %2629 = vmatprep.subr.bf16.mxu0 %v2703_v41 }
 0x6ee   :  { %1862 = vmatmul.mubr.bf16.gmra.mxu0 %v2698_v30 }
 0x6ef   :  { %2630 = vmatpush3.bf16.msra.mxu0 %v2703_v41 }
 0x6f0   :  { %2631 = vmatprep.subr.bf16.mxu0 %v2704_v35 }
 0x6f3   :  { %2632 = vmatpush3.bf16.msra.mxu0 %v2704_v35 }
 0x7a6   :  { %v2493_v62 = vpop.f32.mrf.mxu0 }
 0x7a8   :  { %v2494_v24 = vpop.f32.mrf.mxu0 }
 0x7a9   :  { %v2495_v10 = vadd.f32 %v2494_v24, %v2493_v62 }
 0x7aa   :  { %v2496_v42 = vpop.f32.mrf.mxu0 }
 0x7ac   :  { %v2497_v40 = vpop.f32.mrf.mxu0 }
 0x7ad   :  { %v2498_v39 = vadd.f32 %v2497_v40, %v2496_v42 }
 0x7ae   :  { %v2499_v21 = vpop.f32.mrf.mxu0 }
 0x7af   :  { %v1870_v59 = vpack.c.bf16 %v2498_v39, %v2495_v10 }
 0x7b0   :  { %v2500_v7 = vpop.f32.mrf.mxu0 }
 0x7b1   :  { %2633 = vmatprep.mubr.msk.bf16.mxu0 %vm1031_vm1, %v1870_v59  ;;  %v2501_v36 = vadd.f32 %v2500_v7, %v2499_v21 }
 0x7b2   :  { %v2502_v58 = vpop.f32.mrf.mxu0 }
 0x7b4   :  { %v2503_v47 = vpop.f32.mrf.mxu0 }
 0x7b5   :  { %v2504_v3 = vadd.f32 %v2503_v47, %v2502_v58 }
 0x7b7   :  { %v1871_v18 = vpack.c.bf16 %v2504_v3, %v2501_v36 }
 0x7b9   :  { %2634 = vmatmul.mubr.msk.bf16.vlgmr.msra.gmra.mxu0 %vm1031_vm1, %v1871_v18 }
 0x879   :  { %v2635_v4 = vpop.f32.mrf.mxu0 }
 0x87a   :  { %v1960_v61 = vadd.f32 %v2635_v4, %v2077_v23 }
 0x87b   :  { %v1951_v45 = vpop.f32.mrf.mxu0 }
 0x87c   :  { %2897 = vtanh.f32 %v1960_v61  ;;  %v1952_v34 = vadd.f32 %v2077_v23, %v1951_v45 }
 0x87d   :  { %v2636_v48 = vpop.f32.mrf.mxu0 }
 0x87e   :  { %2899 = vtanh.f32 %v1952_v34  ;;  %v1963_v0 = vadd.f32 %v2636_v48, %v2077_v23 }
 0x87f   :  { %v1954_v33 = vpop.f32.mrf.mxu0 }
 0x880   :  { %2901 = vtanh.f32 %v1963_v0  ;;  %v1955_v12 = vadd.f32 %v2077_v23, %v1954_v33 }
 0x882   :  { %2903 = vtanh.f32 %v1955_v12 }
 0x889   :  { %v2898_v26 = vpop.eup %2897 }
 0x88a   :  { %1972 = vst [vmem:[%s4246_s12 + $0x10] sm:$0xff] %v2898_v26 }
 0x88b   :  { %v2900_v37 = vpop.eup %2899 }
 0x88c   :  { %1970 = vst [vmem:[%s4246_s12] sm:$0xff] %v2900_v37 }
 0x88d   :  { %v2902_v20 = vpop.eup %2901 }
 0x88e   :  { %1973 = vst [vmem:[%s4246_s12 + $0x18] sm:$0xff] %v2902_v20 }
 0x88f   :  { %v2904_v16 = vpop.eup %2903 }
 0x890   :  { %1971 = vst [vmem:[%s4246_s12 + $0x8] sm:$0xff] %v2904_v16 }
 0x891   :  { %1978 = vsyncpa [#allocation3], 1 }

</bundles_post_ra>
